<compile_context>
chip_gen: v7x
topology: tpu7x:2x2x1
jax: 0.10.0
libtpu: 0.0.40
codegen_flags: <defaults>
</compile_context>

<pallas_src>
import functools

import jax
import jax.numpy as jnp
from jax.experimental import pallas as pl
from jax.experimental.pallas import tpu as pltpu


def _mha_flash_kernel(xq_ref, xkv_ref, wq_ref, wkv_ref, wo_ref, bo_ref, o_ref,
                      q_sc, m_sc, l_sc, acc_sc,
                      *, num_heads, head_dim, tq, tkv, compute_dtype):
    qi = pl.program_id(1)
    ki = pl.program_id(2)
    n_kv = pl.num_programs(2)
    d_out = num_heads * head_dim

    q_start = qi * tq
    k_start = ki * tkv

    @pl.when(ki == 0)
    def _init():
        # Project Q once per (batch, q-tile); fold 1/sqrt(head_dim) into Q so
        # we never scale the (tq, tkv) score tile.
        scale = 1.0 / (head_dim ** 0.5)
        q = jnp.dot(xq_ref[...], wq_ref[...],
                    preferred_element_type=jnp.float32)
        q_sc[...] = q * scale
        m_sc[...] = jnp.full_like(m_sc, -jnp.inf)
        l_sc[...] = jnp.zeros_like(l_sc)
        acc_sc[...] = jnp.zeros_like(acc_sc)

    # Skip KV blocks that lie entirely above the causal diagonal.
    @pl.when(k_start <= q_start + tq - 1)
    def _compute():
        # Fused K|V projection: one wide matmul, then value-level slices.
        kv = jnp.dot(xkv_ref[...], wkv_ref[...],
                     preferred_element_type=jnp.float32)       # (tkv, 2*d_out)
        k = kv[:, :d_out].astype(compute_dtype)
        v = kv[:, d_out:].astype(compute_dtype)
        q_all = q_sc[...].astype(compute_dtype)

        # 2D causal mask for this (q-tile, kv-tile) pair; shared by all heads.
        row = q_start + jax.lax.broadcasted_iota(jnp.int32, (tq, tkv), 0)
        col = k_start + jax.lax.broadcasted_iota(jnp.int32, (tq, tkv), 1)
        causal_mask = col > row                                 # True => masked

        for h in range(num_heads):                              # static unroll
            lo, hi = h * head_dim, (h + 1) * head_dim
            qh = q_all[:, lo:hi]                                # (tq,  hd)
            kh = k[:, lo:hi]                                    # (tkv, hd)
            vh = v[:, lo:hi]                                    # (tkv, hd)

            # Plain 2D dot: contract hd on both sides -> (tq, tkv), f32 acc.
            s = jax.lax.dot_general(qh, kh, (((1,), (1,)), ((), ())),
                                    preferred_element_type=jnp.float32)
            s = jnp.where(causal_mask, -jnp.inf, s)

            # Online softmax update (f32 statistics).
            m_prev = m_sc[h]                                    # (tq, 1)
            m_new = jnp.maximum(m_prev, jnp.max(s, axis=-1, keepdims=True))
            alpha = jnp.exp(m_prev - m_new)
            p = jnp.exp(s - m_new)                              # (tq, tkv)
            l_sc[h] = alpha * l_sc[h] + jnp.sum(p, axis=-1, keepdims=True)
            m_sc[h] = m_new
            acc_sc[h] = alpha * acc_sc[h] + jnp.dot(
                p.astype(compute_dtype), vh,
                preferred_element_type=jnp.float32)

    @pl.when(ki == n_kv - 1)
    def _finalize():
        ctx_parts = []
        for h in range(num_heads):
            inv_l = pl.reciprocal(l_sc[h], approx=True)         # EUP slot
            ctx_parts.append(acc_sc[h] * inv_l)
        ctx = jnp.concatenate(ctx_parts, axis=-1)               # (tq, d_out)
        out = jnp.dot(ctx.astype(compute_dtype),
                      wo_ref[...].astype(compute_dtype),
                      preferred_element_type=jnp.float32)
        out = out + bo_ref[...].astype(jnp.float32)
        o_ref[...] = out.astype(o_ref.dtype)


def multi_head_attention(x, wq, wk, wv, wo, bo, *, num_heads,
                         q_tile=128, kv_tile=512):
    """x: (B, T, d_in); wq/wk/wv: (d_in, d_out); wo: (d_out, d_out); bo: (1, d_out)."""
    B, T, d_in = x.shape
    d_out = wq.shape[1]
    assert d_out % num_heads == 0
    head_dim = d_out // num_heads

    tq = T if T <= q_tile else q_tile
    tkv = T if T <= kv_tile else kv_tile
    # TODO(synk): pad T for ragged sequence lengths instead of asserting.
    assert T % tq == 0 and T % tkv == 0, "T must be a multiple of the tile size"
    n_q = T // tq
    n_kv = T // tkv

    # Fuse the K and V projection weights into one wide matmul operand.
    wkv = jnp.concatenate([wk, wv], axis=1)                     # (d_in, 2*d_out)

    kernel = functools.partial(
        _mha_flash_kernel, num_heads=num_heads, head_dim=head_dim,
        tq=tq, tkv=tkv, compute_dtype=x.dtype)

    grid_spec = pltpu.PrefetchScalarGridSpec(
        num_scalar_prefetch=0,
        grid=(B, n_q, n_kv),
        in_specs=[
            # x rows for the Q tile (resident across the kv axis)
            pl.BlockSpec((pl.Squeezed(), tq, d_in), lambda b, qi, ki: (b, qi, 0)),
            # x rows for the K/V tile
            pl.BlockSpec((pl.Squeezed(), tkv, d_in), lambda b, qi, ki: (b, ki, 0)),
            pl.BlockSpec((d_in, d_out), lambda b, qi, ki: (0, 0)),       # wq
            pl.BlockSpec((d_in, 2 * d_out), lambda b, qi, ki: (0, 0)),   # wk|wv
            pl.BlockSpec((d_out, d_out), lambda b, qi, ki: (0, 0)),      # wo
            pl.BlockSpec((1, d_out), lambda b, qi, ki: (0, 0)),          # bo
        ],
        out_specs=pl.BlockSpec((pl.Squeezed(), tq, d_out),
                               lambda b, qi, ki: (b, qi, 0)),
        scratch_shapes=[
            pltpu.VMEM((tq, d_out), jnp.float32),                # scaled Q
            pltpu.VMEM((num_heads, tq, 1), jnp.float32),         # running max
            pltpu.VMEM((num_heads, tq, 1), jnp.float32),         # running denom
            pltpu.VMEM((num_heads, tq, head_dim), jnp.float32),  # ctx accumulator
        ],
    )

    return pl.pallas_call(
        kernel,
        out_shape=jax.ShapeDtypeStruct((B, T, d_out), x.dtype),
        grid_spec=grid_spec,
        compiler_params=pltpu.CompilerParams(
            dimension_semantics=("parallel", "parallel", "arbitrary")),
    )(x, x, wq, wkv, wo, bo)


def reference_mha(x, wq, wk, wv, wo, bo, *, num_heads):
    """Pure-JAX reference mirroring the PyTorch forward (eval mode)."""
    B, T, d_in = x.shape
    d_out = wq.shape[1]
    head_dim = d_out // num_heads
    q = x @ wq
    k = x @ wk
    v = x @ wv
    q = q.reshape(B, T, num_heads, head_dim).transpose(0, 2, 1, 3)
    k = k.reshape(B, T, num_heads, head_dim).transpose(0, 2, 1, 3)
    v = v.reshape(B, T, num_heads, head_dim).transpose(0, 2, 1, 3)
    scores = q @ k.transpose(0, 1, 3, 2)
    mask = jnp.triu(jnp.ones((T, T), dtype=bool), k=1)
    scores = jnp.where(mask[None, None], -jnp.inf, scores)
    w = jax.nn.softmax(scores / head_dim ** 0.5, axis=-1)
    ctx = (w @ v).transpose(0, 2, 1, 3).reshape(B, T, d_out)
    return ctx @ wo + bo


if __name__ == "__main__":
    # Small shapes consistent with the module's forward.
    B, T, d_in = 2, 8, 32
    d_out, num_heads = 32, 4

    key = jax.random.PRNGKey(0)
    kx, kq, kk, kv, ko, kb = jax.random.split(key, 6)

    x = jax.random.normal(kx, (B, T, d_in), dtype=jnp.float32)
    # qkv_bias=False -> no biases on q/k/v; out_proj has a bias.
    wq = jax.random.normal(kq, (d_in, d_out), dtype=jnp.float32) * 0.1
    wk = jax.random.normal(kk, (d_in, d_out), dtype=jnp.float32) * 0.1
    wv = jax.random.normal(kv, (d_in, d_out), dtype=jnp.float32) * 0.1
    wo = jax.random.normal(ko, (d_out, d_out), dtype=jnp.float32) * 0.1
    bo = jax.random.normal(kb, (1, d_out), dtype=jnp.float32) * 0.1

    out = multi_head_attention(x, wq, wk, wv, wo, bo, num_heads=num_heads)
    out = jax.block_until_ready(out)

    ref = reference_mha(x, wq, wk, wv, wo, bo, num_heads=num_heads)
    assert out.shape == (B, T, d_out)
    # Tolerance accounts for the EUP approximate reciprocal in the softmax
    # normalization (f32 accumulation everywhere else).
    assert jnp.allclose(out, ref, atol=2e-3, rtol=2e-3), "mismatch vs reference"

    print("KERNEL_OK")
</pallas_src>

<mosaic_0001>
module attributes {stable_mosaic.version = 11 : i64} {
  func.func @_mha_flash_kernel(%arg0: i32, %arg1: i32, %arg2: i32, %arg3: memref<1x8x32xf32, #tpu.memory_space<vmem>>, %arg4: memref<1x8x32xf32, #tpu.memory_space<vmem>>, %arg5: memref<32x32xf32, #tpu.memory_space<vmem>>, %arg6: memref<32x64xf32, #tpu.memory_space<vmem>>, %arg7: memref<32x32xf32, #tpu.memory_space<vmem>>, %arg8: memref<1x32xf32, #tpu.memory_space<vmem>>, %arg9: memref<1x8x32xf32, #tpu.memory_space<vmem>>, %arg10: memref<8x32xf32, #tpu.memory_space<vmem>>, %arg11: memref<4x8x1xf32, #tpu.memory_space<vmem>>, %arg12: memref<4x8x1xf32, #tpu.memory_space<vmem>>, %arg13: memref<4x8x8xf32, #tpu.memory_space<vmem>>) attributes {dimension_semantics = [#tpu.dimension_semantics<parallel>, #tpu.dimension_semantics<parallel>, #tpu.dimension_semantics<arbitrary>], iteration_bounds = array<i64: 2, 1, 1>, scalar_prefetch = 0 : i64, scratch_operands = 4 : i64, tpu.core_type = #tpu.core_type<tc>, window_params = [{transform_indices = @transform_0, window_bounds = array<i64: 1, 8, 32>}, {transform_indices = @transform_1, window_bounds = array<i64: 1, 8, 32>}, {pipeline_mode = #tpu.pipeline_mode<synchronous>, transform_indices = @transform_2, window_bounds = array<i64: 32, 32>}, {pipeline_mode = #tpu.pipeline_mode<synchronous>, transform_indices = @transform_3, window_bounds = array<i64: 32, 64>}, {pipeline_mode = #tpu.pipeline_mode<synchronous>, transform_indices = @transform_4, window_bounds = array<i64: 32, 32>}, {pipeline_mode = #tpu.pipeline_mode<synchronous>, transform_indices = @transform_5, window_bounds = array<i64: 1, 32>}, {transform_indices = @transform_6, window_bounds = array<i64: 1, 8, 32>}]} {
    %c8_i32 = arith.constant 8 : i32
    %0 = arith.muli %arg1, %c8_i32 : i32
    %c8_i32_0 = arith.constant 8 : i32
    %1 = arith.muli %arg2, %c8_i32_0 : i32
    %c0_i32 = arith.constant 0 : i32
    %2 = arith.cmpi eq, %arg2, %c0_i32 : i32
    %3 = arith.extui %2 : i1 to i32
    %c0_i32_1 = arith.constant 0 : i32
    %4 = arith.cmpi ne, %3, %c0_i32_1 : i32
    scf.if %4 {
      %c0 = arith.constant 0 : index
      %c0_6 = arith.constant 0 : index
      %c0_7 = arith.constant 0 : index
      %13 = vector.load %arg3[%c0, %c0_6, %c0_7] : memref<1x8x32xf32, #tpu.memory_space<vmem>>, vector<1x8x32xf32>
      %14 = vector.shape_cast %13 : vector<1x8x32xf32> to vector<8x32xf32>
      %c0_8 = arith.constant 0 : index
      %c0_9 = arith.constant 0 : index
      %15 = vector.load %arg5[%c0_8, %c0_9] : memref<32x32xf32, #tpu.memory_space<vmem>>, vector<32x32xf32>
      %cst = arith.constant dense<0.000000e+00> : vector<8x32xf32>
      %16 = tpu.matmul %14, %15, %cst {dimension_numbers = #tpu.dot_dimension_numbers<[1], [0], [0], [1], [0, 0, 1, 1], [], []>} : vector<8x32xf32>, vector<32x32xf32>, vector<8x32xf32> -> vector<8x32xf32>
      %cst_10 = arith.constant 0.353553385 : f32
      %17 = vector.broadcast %cst_10 : f32 to vector<8x32xf32>
      %18 = arith.mulf %16, %17 : vector<8x32xf32>
      %c0_11 = arith.constant 0 : index
      %c0_12 = arith.constant 0 : index
      %19 = vector.load %arg10[%c0_11, %c0_12] : memref<8x32xf32, #tpu.memory_space<vmem>>, vector<8x32xf32>
      tpu.vector_store %arg10[%c0_11, %c0_12], %18 {strides = array<i32>} : memref<8x32xf32, #tpu.memory_space<vmem>>, vector<8x32xf32>,
      %cst_13 = arith.constant 0xFF800000 : f32
      %20 = vector.broadcast %cst_13 : f32 to vector<4x8x1xf32>
      %c0_14 = arith.constant 0 : index
      %c0_15 = arith.constant 0 : index
      %c0_16 = arith.constant 0 : index
      %21 = vector.load %arg11[%c0_14, %c0_15, %c0_16] : memref<4x8x1xf32, #tpu.memory_space<vmem>>, vector<4x8x1xf32>
      tpu.vector_store %arg11[%c0_14, %c0_15, %c0_16], %20 {strides = array<i32>} : memref<4x8x1xf32, #tpu.memory_space<vmem>>, vector<4x8x1xf32>,
      %cst_17 = arith.constant 0.000000e+00 : f32
      %22 = vector.broadcast %cst_17 : f32 to vector<4x8x1xf32>
      %c0_18 = arith.constant 0 : index
      %c0_19 = arith.constant 0 : index
      %c0_20 = arith.constant 0 : index
      %23 = vector.load %arg12[%c0_18, %c0_19, %c0_20] : memref<4x8x1xf32, #tpu.memory_space<vmem>>, vector<4x8x1xf32>
      tpu.vector_store %arg12[%c0_18, %c0_19, %c0_20], %22 {strides = array<i32>} : memref<4x8x1xf32, #tpu.memory_space<vmem>>, vector<4x8x1xf32>,
      %cst_21 = arith.constant 0.000000e+00 : f32
      %24 = vector.broadcast %cst_21 : f32 to vector<4x8x8xf32>
      %c0_22 = arith.constant 0 : index
      %c0_23 = arith.constant 0 : index
      %c0_24 = arith.constant 0 : index
      %25 = vector.load %arg13[%c0_22, %c0_23, %c0_24] : memref<4x8x8xf32, #tpu.memory_space<vmem>>, vector<4x8x8xf32>
      tpu.vector_store %arg13[%c0_22, %c0_23, %c0_24], %24 {strides = array<i32>} : memref<4x8x8xf32, #tpu.memory_space<vmem>>, vector<4x8x8xf32>,
    } else {
    }
    %c8_i32_2 = arith.constant 8 : i32
    %5 = arith.addi %0, %c8_i32_2 : i32
    %c1_i32 = arith.constant 1 : i32
    %6 = arith.subi %5, %c1_i32 : i32
    %7 = arith.cmpi sle, %1, %6 : i32
    %8 = arith.extui %7 : i1 to i32
    %c0_i32_3 = arith.constant 0 : i32
    %9 = arith.cmpi ne, %8, %c0_i32_3 : i32
    scf.if %9 {
      %c0 = arith.constant 0 : index
      %c0_6 = arith.constant 0 : index
      %c0_7 = arith.constant 0 : index
      %13 = vector.load %arg4[%c0, %c0_6, %c0_7] : memref<1x8x32xf32, #tpu.memory_space<vmem>>, vector<1x8x32xf32>
      %14 = vector.shape_cast %13 : vector<1x8x32xf32> to vector<8x32xf32>
      %c0_8 = arith.constant 0 : index
      %c0_9 = arith.constant 0 : index
      %15 = vector.load %arg6[%c0_8, %c0_9] : memref<32x64xf32, #tpu.memory_space<vmem>>, vector<32x64xf32>
      %cst = arith.constant dense<0.000000e+00> : vector<8x64xf32>
      %16 = tpu.matmul %14, %15, %cst {dimension_numbers = #tpu.dot_dimension_numbers<[1], [0], [0], [1], [0, 0, 1, 1], [], []>} : vector<8x32xf32>, vector<32x64xf32>, vector<8x64xf32> -> vector<8x64xf32>
      %17 = vector.extract_strided_slice %16 {offsets = [0, 0], sizes = [8, 32], strides = [1, 1]} : vector<8x64xf32> to vector<8x32xf32>
      %18 = vector.extract_strided_slice %16 {offsets = [0, 32], sizes = [8, 32], strides = [1, 1]} : vector<8x64xf32> to vector<8x32xf32>
      %c0_10 = arith.constant 0 : index
      %c0_11 = arith.constant 0 : index
      %19 = vector.load %arg10[%c0_10, %c0_11] : memref<8x32xf32, #tpu.memory_space<vmem>>, vector<8x32xf32>
      %20 = tpu.iota {dimensions = array<i32: 0>} : vector<8x8xi32>
      %21 = vector.broadcast %0 : i32 to vector<8x8xi32>
      %22 = arith.addi %21, %20 : vector<8x8xi32>
      %23 = tpu.iota {dimensions = array<i32: 1>} : vector<8x8xi32>
      %24 = vector.broadcast %1 : i32 to vector<8x8xi32>
      %25 = arith.addi %24, %23 : vector<8x8xi32>
      %26 = arith.cmpi sgt, %25, %22 : vector<8x8xi32>
      %27 = vector.extract_strided_slice %19 {offsets = [0, 0], sizes = [8, 8], strides = [1, 1]} : vector<8x32xf32> to vector<8x8xf32>
      %28 = vector.extract_strided_slice %17 {offsets = [0, 0], sizes = [8, 8], strides = [1, 1]} : vector<8x32xf32> to vector<8x8xf32>
      %29 = vector.extract_strided_slice %18 {offsets = [0, 0], sizes = [8, 8], strides = [1, 1]} : vector<8x32xf32> to vector<8x8xf32>
      %cst_12 = arith.constant dense<0.000000e+00> : vector<8x8xf32>
      %30 = tpu.matmul %27, %28, %cst_12 {dimension_numbers = #tpu.dot_dimension_numbers<[1], [1], [0], [0], [0, 0, 1, 0], [], []>} : vector<8x8xf32>, vector<8x8xf32>, vector<8x8xf32> -> vector<8x8xf32>
      %cst_13 = arith.constant 0xFF800000 : f32
      %31 = vector.broadcast %cst_13 : f32 to vector<8x8xf32>
      %32 = arith.select %26, %31, %30 : vector<8x8xi1>, vector<8x8xf32>
      %c0_14 = arith.constant 0 : index
      %c0_15 = arith.constant 0 : index
      %c0_16 = arith.constant 0 : index
      %33 = vector.load %arg11[%c0_14, %c0_15, %c0_16] : memref<4x8x1xf32, #tpu.memory_space<vmem>>, vector<1x8x1xf32>
      %34 = vector.shape_cast %33 : vector<1x8x1xf32> to vector<8x1xf32>
      %cst_17 = arith.constant dense<0xFF800000> : vector<8xf32>
      %35 = vector.multi_reduction <maximumf>, %32, %cst_17 [1] : vector<8x8xf32> to vector<8xf32>
      %36 = vector.shape_cast %35 : vector<8xf32> to vector<8x1xf32>
      %37 = arith.maximumf %34, %36 : vector<8x1xf32>
      %38 = arith.subf %34, %37 : vector<8x1xf32>
      %39 = math.exp %38 : vector<8x1xf32>
      %40 = vector.broadcast %37 : vector<8x1xf32> to vector<8x8xf32>
      %41 = arith.subf %32, %40 : vector<8x8xf32>
      %42 = math.exp %41 : vector<8x8xf32>
      %c0_18 = arith.constant 0 : index
      %c0_19 = arith.constant 0 : index
      %c0_20 = arith.constant 0 : index
      %43 = vector.load %arg12[%c0_18, %c0_19, %c0_20] : memref<4x8x1xf32, #tpu.memory_space<vmem>>, vector<1x8x1xf32>
      %44 = vector.shape_cast %43 : vector<1x8x1xf32> to vector<8x1xf32>
      %45 = arith.mulf %39, %44 : vector<8x1xf32>
      %cst_21 = arith.constant dense<0.000000e+00> : vector<8xf32>
      %46 = vector.multi_reduction <add>, %42, %cst_21 [1] : vector<8x8xf32> to vector<8xf32>
      %47 = vector.shape_cast %46 : vector<8xf32> to vector<8x1xf32>
      %48 = arith.addf %45, %47 : vector<8x1xf32>
      %c0_22 = arith.constant 0 : index
      %c0_23 = arith.constant 0 : index
      %c0_24 = arith.constant 0 : index
      %49 = vector.load %arg12[%c0_22, %c0_23, %c0_24] : memref<4x8x1xf32, #tpu.memory_space<vmem>>, vector<1x8x1xf32>
      %50 = vector.shape_cast %49 : vector<1x8x1xf32> to vector<8x1xf32>
      %51 = vector.shape_cast %48 : vector<8x1xf32> to vector<1x8x1xf32>
      tpu.vector_store %arg12[%c0_22, %c0_23, %c0_24], %51 {strides = array<i32>} : memref<4x8x1xf32, #tpu.memory_space<vmem>>, vector<1x8x1xf32>,
      %c0_25 = arith.constant 0 : index
      %c0_26 = arith.constant 0 : index
      %c0_27 = arith.constant 0 : index
      %52 = vector.load %arg11[%c0_25, %c0_26, %c0_27] : memref<4x8x1xf32, #tpu.memory_space<vmem>>, vector<1x8x1xf32>
      %53 = vector.shape_cast %52 : vector<1x8x1xf32> to vector<8x1xf32>
      %54 = vector.shape_cast %37 : vector<8x1xf32> to vector<1x8x1xf32>
      tpu.vector_store %arg11[%c0_25, %c0_26, %c0_27], %54 {strides = array<i32>} : memref<4x8x1xf32, #tpu.memory_space<vmem>>, vector<1x8x1xf32>,
      %c0_28 = arith.constant 0 : index
      %c0_29 = arith.constant 0 : index
      %c0_30 = arith.constant 0 : index
      %55 = vector.load %arg13[%c0_28, %c0_29, %c0_30] : memref<4x8x8xf32, #tpu.memory_space<vmem>>, vector<1x8x8xf32>
      %56 = vector.shape_cast %55 : vector<1x8x8xf32> to vector<8x8xf32>
      %57 = vector.broadcast %39 : vector<8x1xf32> to vector<8x8xf32>
      %58 = arith.mulf %57, %56 : vector<8x8xf32>
      %cst_31 = arith.constant dense<0.000000e+00> : vector<8x8xf32>
      %59 = tpu.matmul %42, %29, %cst_31 {dimension_numbers = #tpu.dot_dimension_numbers<[1], [0], [0], [1], [0, 0, 1, 1], [], []>} : vector<8x8xf32>, vector<8x8xf32>, vector<8x8xf32> -> vector<8x8xf32>
      %60 = arith.addf %58, %59 : vector<8x8xf32>
      %c0_32 = arith.constant 0 : index
      %c0_33 = arith.constant 0 : index
      %c0_34 = arith.constant 0 : index
      %61 = vector.load %arg13[%c0_32, %c0_33, %c0_34] : memref<4x8x8xf32, #tpu.memory_space<vmem>>, vector<1x8x8xf32>
      %62 = vector.shape_cast %61 : vector<1x8x8xf32> to vector<8x8xf32>
      %63 = vector.shape_cast %60 : vector<8x8xf32> to vector<1x8x8xf32>
      tpu.vector_store %arg13[%c0_32, %c0_33, %c0_34], %63 {strides = array<i32>} : memref<4x8x8xf32, #tpu.memory_space<vmem>>, vector<1x8x8xf32>,
      %64 = vector.extract_strided_slice %19 {offsets = [0, 8], sizes = [8, 8], strides = [1, 1]} : vector<8x32xf32> to vector<8x8xf32>
      %65 = vector.extract_strided_slice %17 {offsets = [0, 8], sizes = [8, 8], strides = [1, 1]} : vector<8x32xf32> to vector<8x8xf32>
      %66 = vector.extract_strided_slice %18 {offsets = [0, 8], sizes = [8, 8], strides = [1, 1]} : vector<8x32xf32> to vector<8x8xf32>
      %cst_35 = arith.constant dense<0.000000e+00> : vector<8x8xf32>
      %67 = tpu.matmul %64, %65, %cst_35 {dimension_numbers = #tpu.dot_dimension_numbers<[1], [1], [0], [0], [0, 0, 1, 0], [], []>} : vector<8x8xf32>, vector<8x8xf32>, vector<8x8xf32> -> vector<8x8xf32>
      %cst_36 = arith.constant 0xFF800000 : f32
      %68 = vector.broadcast %cst_36 : f32 to vector<8x8xf32>
      %69 = arith.select %26, %68, %67 : vector<8x8xi1>, vector<8x8xf32>
      %c1 = arith.constant 1 : index
      %c0_37 = arith.constant 0 : index
      %c0_38 = arith.constant 0 : index
      %70 = vector.load %arg11[%c1, %c0_37, %c0_38] : memref<4x8x1xf32, #tpu.memory_space<vmem>>, vector<1x8x1xf32>
      %71 = vector.shape_cast %70 : vector<1x8x1xf32> to vector<8x1xf32>
      %cst_39 = arith.constant dense<0xFF800000> : vector<8xf32>
      %72 = vector.multi_reduction <maximumf>, %69, %cst_39 [1] : vector<8x8xf32> to vector<8xf32>
      %73 = vector.shape_cast %72 : vector<8xf32> to vector<8x1xf32>
      %74 = arith.maximumf %71, %73 : vector<8x1xf32>
      %75 = arith.subf %71, %74 : vector<8x1xf32>
      %76 = math.exp %75 : vector<8x1xf32>
      %77 = vector.broadcast %74 : vector<8x1xf32> to vector<8x8xf32>
      %78 = arith.subf %69, %77 : vector<8x8xf32>
      %79 = math.exp %78 : vector<8x8xf32>
      %c1_40 = arith.constant 1 : index
      %c0_41 = arith.constant 0 : index
      %c0_42 = arith.constant 0 : index
      %80 = vector.load %arg12[%c1_40, %c0_41, %c0_42] : memref<4x8x1xf32, #tpu.memory_space<vmem>>, vector<1x8x1xf32>
      %81 = vector.shape_cast %80 : vector<1x8x1xf32> to vector<8x1xf32>
      %82 = arith.mulf %76, %81 : vector<8x1xf32>
      %cst_43 = arith.constant dense<0.000000e+00> : vector<8xf32>
      %83 = vector.multi_reduction <add>, %79, %cst_43 [1] : vector<8x8xf32> to vector<8xf32>
      %84 = vector.shape_cast %83 : vector<8xf32> to vector<8x1xf32>
      %85 = arith.addf %82, %84 : vector<8x1xf32>
      %c1_44 = arith.constant 1 : index
      %c0_45 = arith.constant 0 : index
      %c0_46 = arith.constant 0 : index
      %86 = vector.load %arg12[%c1_44, %c0_45, %c0_46] : memref<4x8x1xf32, #tpu.memory_space<vmem>>, vector<1x8x1xf32>
      %87 = vector.shape_cast %86 : vector<1x8x1xf32> to vector<8x1xf32>
      %88 = vector.shape_cast %85 : vector<8x1xf32> to vector<1x8x1xf32>
      tpu.vector_store %arg12[%c1_44, %c0_45, %c0_46], %88 {strides = array<i32>} : memref<4x8x1xf32, #tpu.memory_space<vmem>>, vector<1x8x1xf32>,
      %c1_47 = arith.constant 1 : index
      %c0_48 = arith.constant 0 : index
      %c0_49 = arith.constant 0 : index
      %89 = vector.load %arg11[%c1_47, %c0_48, %c0_49] : memref<4x8x1xf32, #tpu.memory_space<vmem>>, vector<1x8x1xf32>
      %90 = vector.shape_cast %89 : vector<1x8x1xf32> to vector<8x1xf32>
      %91 = vector.shape_cast %74 : vector<8x1xf32> to vector<1x8x1xf32>
      tpu.vector_store %arg11[%c1_47, %c0_48, %c0_49], %91 {strides = array<i32>} : memref<4x8x1xf32, #tpu.memory_space<vmem>>, vector<1x8x1xf32>,
      %c1_50 = arith.constant 1 : index
      %c0_51 = arith.constant 0 : index
      %c0_52 = arith.constant 0 : index
      %92 = vector.load %arg13[%c1_50, %c0_51, %c0_52] : memref<4x8x8xf32, #tpu.memory_space<vmem>>, vector<1x8x8xf32>
      %93 = vector.shape_cast %92 : vector<1x8x8xf32> to vector<8x8xf32>
      %94 = vector.broadcast %76 : vector<8x1xf32> to vector<8x8xf32>
      %95 = arith.mulf %94, %93 : vector<8x8xf32>
      %cst_53 = arith.constant dense<0.000000e+00> : vector<8x8xf32>
      %96 = tpu.matmul %79, %66, %cst_53 {dimension_numbers = #tpu.dot_dimension_numbers<[1], [0], [0], [1], [0, 0, 1, 1], [], []>} : vector<8x8xf32>, vector<8x8xf32>, vector<8x8xf32> -> vector<8x8xf32>
      %97 = arith.addf %95, %96 : vector<8x8xf32>
      %c1_54 = arith.constant 1 : index
      %c0_55 = arith.constant 0 : index
      %c0_56 = arith.constant 0 : index
      %98 = vector.load %arg13[%c1_54, %c0_55, %c0_56] : memref<4x8x8xf32, #tpu.memory_space<vmem>>, vector<1x8x8xf32>
      %99 = vector.shape_cast %98 : vector<1x8x8xf32> to vector<8x8xf32>
      %100 = vector.shape_cast %97 : vector<8x8xf32> to vector<1x8x8xf32>
      tpu.vector_store %arg13[%c1_54, %c0_55, %c0_56], %100 {strides = array<i32>} : memref<4x8x8xf32, #tpu.memory_space<vmem>>, vector<1x8x8xf32>,
      %101 = vector.extract_strided_slice %19 {offsets = [0, 16], sizes = [8, 8], strides = [1, 1]} : vector<8x32xf32> to vector<8x8xf32>
      %102 = vector.extract_strided_slice %17 {offsets = [0, 16], sizes = [8, 8], strides = [1, 1]} : vector<8x32xf32> to vector<8x8xf32>
      %103 = vector.extract_strided_slice %18 {offsets = [0, 16], sizes = [8, 8], strides = [1, 1]} : vector<8x32xf32> to vector<8x8xf32>
      %cst_57 = arith.constant dense<0.000000e+00> : vector<8x8xf32>
      %104 = tpu.matmul %101, %102, %cst_57 {dimension_numbers = #tpu.dot_dimension_numbers<[1], [1], [0], [0], [0, 0, 1, 0], [], []>} : vector<8x8xf32>, vector<8x8xf32>, vector<8x8xf32> -> vector<8x8xf32>
      %cst_58 = arith.constant 0xFF800000 : f32
      %105 = vector.broadcast %cst_58 : f32 to vector<8x8xf32>
      %106 = arith.select %26, %105, %104 : vector<8x8xi1>, vector<8x8xf32>
      %c2 = arith.constant 2 : index
      %c0_59 = arith.constant 0 : index
      %c0_60 = arith.constant 0 : index
      %107 = vector.load %arg11[%c2, %c0_59, %c0_60] : memref<4x8x1xf32, #tpu.memory_space<vmem>>, vector<1x8x1xf32>
      %108 = vector.shape_cast %107 : vector<1x8x1xf32> to vector<8x1xf32>
      %cst_61 = arith.constant dense<0xFF800000> : vector<8xf32>
      %109 = vector.multi_reduction <maximumf>, %106, %cst_61 [1] : vector<8x8xf32> to vector<8xf32>
      %110 = vector.shape_cast %109 : vector<8xf32> to vector<8x1xf32>
      %111 = arith.maximumf %108, %110 : vector<8x1xf32>
      %112 = arith.subf %108, %111 : vector<8x1xf32>
      %113 = math.exp %112 : vector<8x1xf32>
      %114 = vector.broadcast %111 : vector<8x1xf32> to vector<8x8xf32>
      %115 = arith.subf %106, %114 : vector<8x8xf32>
      %116 = math.exp %115 : vector<8x8xf32>
      %c2_62 = arith.constant 2 : index
      %c0_63 = arith.constant 0 : index
      %c0_64 = arith.constant 0 : index
      %117 = vector.load %arg12[%c2_62, %c0_63, %c0_64] : memref<4x8x1xf32, #tpu.memory_space<vmem>>, vector<1x8x1xf32>
      %118 = vector.shape_cast %117 : vector<1x8x1xf32> to vector<8x1xf32>
      %119 = arith.mulf %113, %118 : vector<8x1xf32>
      %cst_65 = arith.constant dense<0.000000e+00> : vector<8xf32>
      %120 = vector.multi_reduction <add>, %116, %cst_65 [1] : vector<8x8xf32> to vector<8xf32>
      %121 = vector.shape_cast %120 : vector<8xf32> to vector<8x1xf32>
      %122 = arith.addf %119, %121 : vector<8x1xf32>
      %c2_66 = arith.constant 2 : index
      %c0_67 = arith.constant 0 : index
      %c0_68 = arith.constant 0 : index
      %123 = vector.load %arg12[%c2_66, %c0_67, %c0_68] : memref<4x8x1xf32, #tpu.memory_space<vmem>>, vector<1x8x1xf32>
      %124 = vector.shape_cast %123 : vector<1x8x1xf32> to vector<8x1xf32>
      %125 = vector.shape_cast %122 : vector<8x1xf32> to vector<1x8x1xf32>
      tpu.vector_store %arg12[%c2_66, %c0_67, %c0_68], %125 {strides = array<i32>} : memref<4x8x1xf32, #tpu.memory_space<vmem>>, vector<1x8x1xf32>,
      %c2_69 = arith.constant 2 : index
      %c0_70 = arith.constant 0 : index
      %c0_71 = arith.constant 0 : index
      %126 = vector.load %arg11[%c2_69, %c0_70, %c0_71] : memref<4x8x1xf32, #tpu.memory_space<vmem>>, vector<1x8x1xf32>
      %127 = vector.shape_cast %126 : vector<1x8x1xf32> to vector<8x1xf32>
      %128 = vector.shape_cast %111 : vector<8x1xf32> to vector<1x8x1xf32>
      tpu.vector_store %arg11[%c2_69, %c0_70, %c0_71], %128 {strides = array<i32>} : memref<4x8x1xf32, #tpu.memory_space<vmem>>, vector<1x8x1xf32>,
      %c2_72 = arith.constant 2 : index
      %c0_73 = arith.constant 0 : index
      %c0_74 = arith.constant 0 : index
      %129 = vector.load %arg13[%c2_72, %c0_73, %c0_74] : memref<4x8x8xf32, #tpu.memory_space<vmem>>, vector<1x8x8xf32>
      %130 = vector.shape_cast %129 : vector<1x8x8xf32> to vector<8x8xf32>
      %131 = vector.broadcast %113 : vector<8x1xf32> to vector<8x8xf32>
      %132 = arith.mulf %131, %130 : vector<8x8xf32>
      %cst_75 = arith.constant dense<0.000000e+00> : vector<8x8xf32>
      %133 = tpu.matmul %116, %103, %cst_75 {dimension_numbers = #tpu.dot_dimension_numbers<[1], [0], [0], [1], [0, 0, 1, 1], [], []>} : vector<8x8xf32>, vector<8x8xf32>, vector<8x8xf32> -> vector<8x8xf32>
      %134 = arith.addf %132, %133 : vector<8x8xf32>
      %c2_76 = arith.constant 2 : index
      %c0_77 = arith.constant 0 : index
      %c0_78 = arith.constant 0 : index
      %135 = vector.load %arg13[%c2_76, %c0_77, %c0_78] : memref<4x8x8xf32, #tpu.memory_space<vmem>>, vector<1x8x8xf32>
      %136 = vector.shape_cast %135 : vector<1x8x8xf32> to vector<8x8xf32>
      %137 = vector.shape_cast %134 : vector<8x8xf32> to vector<1x8x8xf32>
      tpu.vector_store %arg13[%c2_76, %c0_77, %c0_78], %137 {strides = array<i32>} : memref<4x8x8xf32, #tpu.memory_space<vmem>>, vector<1x8x8xf32>,
      %138 = vector.extract_strided_slice %19 {offsets = [0, 24], sizes = [8, 8], strides = [1, 1]} : vector<8x32xf32> to vector<8x8xf32>
      %139 = vector.extract_strided_slice %17 {offsets = [0, 24], sizes = [8, 8], strides = [1, 1]} : vector<8x32xf32> to vector<8x8xf32>
      %140 = vector.extract_strided_slice %18 {offsets = [0, 24], sizes = [8, 8], strides = [1, 1]} : vector<8x32xf32> to vector<8x8xf32>
      %cst_79 = arith.constant dense<0.000000e+00> : vector<8x8xf32>
      %141 = tpu.matmul %138, %139, %cst_79 {dimension_numbers = #tpu.dot_dimension_numbers<[1], [1], [0], [0], [0, 0, 1, 0], [], []>} : vector<8x8xf32>, vector<8x8xf32>, vector<8x8xf32> -> vector<8x8xf32>
      %cst_80 = arith.constant 0xFF800000 : f32
      %142 = vector.broadcast %cst_80 : f32 to vector<8x8xf32>
      %143 = arith.select %26, %142, %141 : vector<8x8xi1>, vector<8x8xf32>
      %c3 = arith.constant 3 : index
      %c0_81 = arith.constant 0 : index
      %c0_82 = arith.constant 0 : index
      %144 = vector.load %arg11[%c3, %c0_81, %c0_82] : memref<4x8x1xf32, #tpu.memory_space<vmem>>, vector<1x8x1xf32>
      %145 = vector.shape_cast %144 : vector<1x8x1xf32> to vector<8x1xf32>
      %cst_83 = arith.constant dense<0xFF800000> : vector<8xf32>
      %146 = vector.multi_reduction <maximumf>, %143, %cst_83 [1] : vector<8x8xf32> to vector<8xf32>
      %147 = vector.shape_cast %146 : vector<8xf32> to vector<8x1xf32>
      %148 = arith.maximumf %145, %147 : vector<8x1xf32>
      %149 = arith.subf %145, %148 : vector<8x1xf32>
      %150 = math.exp %149 : vector<8x1xf32>
      %151 = vector.broadcast %148 : vector<8x1xf32> to vector<8x8xf32>
      %152 = arith.subf %143, %151 : vector<8x8xf32>
      %153 = math.exp %152 : vector<8x8xf32>
      %c3_84 = arith.constant 3 : index
      %c0_85 = arith.constant 0 : index
      %c0_86 = arith.constant 0 : index
      %154 = vector.load %arg12[%c3_84, %c0_85, %c0_86] : memref<4x8x1xf32, #tpu.memory_space<vmem>>, vector<1x8x1xf32>
      %155 = vector.shape_cast %154 : vector<1x8x1xf32> to vector<8x1xf32>
      %156 = arith.mulf %150, %155 : vector<8x1xf32>
      %cst_87 = arith.constant dense<0.000000e+00> : vector<8xf32>
      %157 = vector.multi_reduction <add>, %153, %cst_87 [1] : vector<8x8xf32> to vector<8xf32>
      %158 = vector.shape_cast %157 : vector<8xf32> to vector<8x1xf32>
      %159 = arith.addf %156, %158 : vector<8x1xf32>
      %c3_88 = arith.constant 3 : index
      %c0_89 = arith.constant 0 : index
      %c0_90 = arith.constant 0 : index
      %160 = vector.load %arg12[%c3_88, %c0_89, %c0_90] : memref<4x8x1xf32, #tpu.memory_space<vmem>>, vector<1x8x1xf32>
      %161 = vector.shape_cast %160 : vector<1x8x1xf32> to vector<8x1xf32>
      %162 = vector.shape_cast %159 : vector<8x1xf32> to vector<1x8x1xf32>
      tpu.vector_store %arg12[%c3_88, %c0_89, %c0_90], %162 {strides = array<i32>} : memref<4x8x1xf32, #tpu.memory_space<vmem>>, vector<1x8x1xf32>,
      %c3_91 = arith.constant 3 : index
      %c0_92 = arith.constant 0 : index
      %c0_93 = arith.constant 0 : index
      %163 = vector.load %arg11[%c3_91, %c0_92, %c0_93] : memref<4x8x1xf32, #tpu.memory_space<vmem>>, vector<1x8x1xf32>
      %164 = vector.shape_cast %163 : vector<1x8x1xf32> to vector<8x1xf32>
      %165 = vector.shape_cast %148 : vector<8x1xf32> to vector<1x8x1xf32>
      tpu.vector_store %arg11[%c3_91, %c0_92, %c0_93], %165 {strides = array<i32>} : memref<4x8x1xf32, #tpu.memory_space<vmem>>, vector<1x8x1xf32>,
      %c3_94 = arith.constant 3 : index
      %c0_95 = arith.constant 0 : index
      %c0_96 = arith.constant 0 : index
      %166 = vector.load %arg13[%c3_94, %c0_95, %c0_96] : memref<4x8x8xf32, #tpu.memory_space<vmem>>, vector<1x8x8xf32>
      %167 = vector.shape_cast %166 : vector<1x8x8xf32> to vector<8x8xf32>
      %168 = vector.broadcast %150 : vector<8x1xf32> to vector<8x8xf32>
      %169 = arith.mulf %168, %167 : vector<8x8xf32>
      %cst_97 = arith.constant dense<0.000000e+00> : vector<8x8xf32>
      %170 = tpu.matmul %153, %140, %cst_97 {dimension_numbers = #tpu.dot_dimension_numbers<[1], [0], [0], [1], [0, 0, 1, 1], [], []>} : vector<8x8xf32>, vector<8x8xf32>, vector<8x8xf32> -> vector<8x8xf32>
      %171 = arith.addf %169, %170 : vector<8x8xf32>
      %c3_98 = arith.constant 3 : index
      %c0_99 = arith.constant 0 : index
      %c0_100 = arith.constant 0 : index
      %172 = vector.load %arg13[%c3_98, %c0_99, %c0_100] : memref<4x8x8xf32, #tpu.memory_space<vmem>>, vector<1x8x8xf32>
      %173 = vector.shape_cast %172 : vector<1x8x8xf32> to vector<8x8xf32>
      %174 = vector.shape_cast %171 : vector<8x8xf32> to vector<1x8x8xf32>
      tpu.vector_store %arg13[%c3_98, %c0_99, %c0_100], %174 {strides = array<i32>} : memref<4x8x8xf32, #tpu.memory_space<vmem>>, vector<1x8x8xf32>,
    } else {
    }
    %c0_i32_4 = arith.constant 0 : i32
    %10 = arith.cmpi eq, %arg2, %c0_i32_4 : i32
    %11 = arith.extui %10 : i1 to i32
    %c0_i32_5 = arith.constant 0 : i32
    %12 = arith.cmpi ne, %11, %c0_i32_5 : i32
    scf.if %12 {
      %c0 = arith.constant 0 : index
      %c0_6 = arith.constant 0 : index
      %c0_7 = arith.constant 0 : index
      %13 = vector.load %arg12[%c0, %c0_6, %c0_7] : memref<4x8x1xf32, #tpu.memory_space<vmem>>, vector<1x8x1xf32>
      %14 = vector.shape_cast %13 : vector<1x8x1xf32> to vector<8x1xf32>
      %15 = tpu.reciprocal %14 {approx = true} : vector<8x1xf32> -> vector<8x1xf32>
      %c0_8 = arith.constant 0 : index
      %c0_9 = arith.constant 0 : index
      %c0_10 = arith.constant 0 : index
      %16 = vector.load %arg13[%c0_8, %c0_9, %c0_10] : memref<4x8x8xf32, #tpu.memory_space<vmem>>, vector<1x8x8xf32>
      %17 = vector.shape_cast %16 : vector<1x8x8xf32> to vector<8x8xf32>
      %18 = vector.broadcast %15 : vector<8x1xf32> to vector<8x8xf32>
      %19 = arith.mulf %17, %18 : vector<8x8xf32>
      %c1 = arith.constant 1 : index
      %c0_11 = arith.constant 0 : index
      %c0_12 = arith.constant 0 : index
      %20 = vector.load %arg12[%c1, %c0_11, %c0_12] : memref<4x8x1xf32, #tpu.memory_space<vmem>>, vector<1x8x1xf32>
      %21 = vector.shape_cast %20 : vector<1x8x1xf32> to vector<8x1xf32>
      %22 = tpu.reciprocal %21 {approx = true} : vector<8x1xf32> -> vector<8x1xf32>
      %c1_13 = arith.constant 1 : index
      %c0_14 = arith.constant 0 : index
      %c0_15 = arith.constant 0 : index
      %23 = vector.load %arg13[%c1_13, %c0_14, %c0_15] : memref<4x8x8xf32, #tpu.memory_space<vmem>>, vector<1x8x8xf32>
      %24 = vector.shape_cast %23 : vector<1x8x8xf32> to vector<8x8xf32>
      %25 = vector.broadcast %22 : vector<8x1xf32> to vector<8x8xf32>
      %26 = arith.mulf %24, %25 : vector<8x8xf32>
      %c2 = arith.constant 2 : index
      %c0_16 = arith.constant 0 : index
      %c0_17 = arith.constant 0 : index
      %27 = vector.load %arg12[%c2, %c0_16, %c0_17] : memref<4x8x1xf32, #tpu.memory_space<vmem>>, vector<1x8x1xf32>
      %28 = vector.shape_cast %27 : vector<1x8x1xf32> to vector<8x1xf32>
      %29 = tpu.reciprocal %28 {approx = true} : vector<8x1xf32> -> vector<8x1xf32>
      %c2_18 = arith.constant 2 : index
      %c0_19 = arith.constant 0 : index
      %c0_20 = arith.constant 0 : index
      %30 = vector.load %arg13[%c2_18, %c0_19, %c0_20] : memref<4x8x8xf32, #tpu.memory_space<vmem>>, vector<1x8x8xf32>
      %31 = vector.shape_cast %30 : vector<1x8x8xf32> to vector<8x8xf32>
      %32 = vector.broadcast %29 : vector<8x1xf32> to vector<8x8xf32>
      %33 = arith.mulf %31, %32 : vector<8x8xf32>
      %c3 = arith.constant 3 : index
      %c0_21 = arith.constant 0 : index
      %c0_22 = arith.constant 0 : index
      %34 = vector.load %arg12[%c3, %c0_21, %c0_22] : memref<4x8x1xf32, #tpu.memory_space<vmem>>, vector<1x8x1xf32>
      %35 = vector.shape_cast %34 : vector<1x8x1xf32> to vector<8x1xf32>
      %36 = tpu.reciprocal %35 {approx = true} : vector<8x1xf32> -> vector<8x1xf32>
      %c3_23 = arith.constant 3 : index
      %c0_24 = arith.constant 0 : index
      %c0_25 = arith.constant 0 : index
      %37 = vector.load %arg13[%c3_23, %c0_24, %c0_25] : memref<4x8x8xf32, #tpu.memory_space<vmem>>, vector<1x8x8xf32>
      %38 = vector.shape_cast %37 : vector<1x8x8xf32> to vector<8x8xf32>
      %39 = vector.broadcast %36 : vector<8x1xf32> to vector<8x8xf32>
      %40 = arith.mulf %38, %39 : vector<8x8xf32>
      %41 = tpu.concatenate %19, %26, %33, %40 in 1 : vector<8x8xf32>, vector<8x8xf32>, vector<8x8xf32>, vector<8x8xf32> -> vector<8x32xf32>
      %c0_26 = arith.constant 0 : index
      %c0_27 = arith.constant 0 : index
      %42 = vector.load %arg7[%c0_26, %c0_27] : memref<32x32xf32, #tpu.memory_space<vmem>>, vector<32x32xf32>
      %cst = arith.constant dense<0.000000e+00> : vector<8x32xf32>
      %43 = tpu.matmul %41, %42, %cst {dimension_numbers = #tpu.dot_dimension_numbers<[1], [0], [0], [1], [0, 0, 1, 1], [], []>} : vector<8x32xf32>, vector<32x32xf32>, vector<8x32xf32> -> vector<8x32xf32>
      %c0_28 = arith.constant 0 : index
      %c0_29 = arith.constant 0 : index
      %44 = vector.load %arg8[%c0_28, %c0_29] : memref<1x32xf32, #tpu.memory_space<vmem>>, vector<1x32xf32>
      %45 = vector.broadcast %44 : vector<1x32xf32> to vector<8x32xf32>
      %46 = arith.addf %43, %45 : vector<8x32xf32>
      %c0_30 = arith.constant 0 : index
      %c0_31 = arith.constant 0 : index
      %c0_32 = arith.constant 0 : index
      %47 = vector.load %arg9[%c0_30, %c0_31, %c0_32] : memref<1x8x32xf32, #tpu.memory_space<vmem>>, vector<1x8x32xf32>
      %48 = vector.shape_cast %47 : vector<1x8x32xf32> to vector<8x32xf32>
      %49 = vector.shape_cast %46 : vector<8x32xf32> to vector<1x8x32xf32>
      tpu.vector_store %arg9[%c0_30, %c0_31, %c0_32], %49 {strides = array<i32>} : memref<1x8x32xf32, #tpu.memory_space<vmem>>, vector<1x8x32xf32>,
    } else {
    }
    return
  }
  func.func @transform_0(%arg0: i32, %arg1: i32, %arg2: i32) -> (i32, i32, i32) {
    %c0_i32 = arith.constant 0 : i32
    %c0_i32_0 = arith.constant 0 : i32
    return %arg0, %arg1, %c0_i32 : i32, i32, i32
  }
  func.func @transform_1(%arg0: i32, %arg1: i32, %arg2: i32) -> (i32, i32, i32) {
    %c0_i32 = arith.constant 0 : i32
    %c0_i32_0 = arith.constant 0 : i32
    return %arg0, %arg2, %c0_i32 : i32, i32, i32
  }
  func.func @transform_2(%arg0: i32, %arg1: i32, %arg2: i32) -> (i32, i32) {
    %c0_i32 = arith.constant 0 : i32
    %c0_i32_0 = arith.constant 0 : i32
    %c0_i32_1 = arith.constant 0 : i32
    return %c0_i32, %c0_i32_0 : i32, i32
  }
  func.func @transform_3(%arg0: i32, %arg1: i32, %arg2: i32) -> (i32, i32) {
    %c0_i32 = arith.constant 0 : i32
    %c0_i32_0 = arith.constant 0 : i32
    %c0_i32_1 = arith.constant 0 : i32
    return %c0_i32, %c0_i32_0 : i32, i32
  }
  func.func @transform_4(%arg0: i32, %arg1: i32, %arg2: i32) -> (i32, i32) {
    %c0_i32 = arith.constant 0 : i32
    %c0_i32_0 = arith.constant 0 : i32
    %c0_i32_1 = arith.constant 0 : i32
    return %c0_i32, %c0_i32_0 : i32, i32
  }
  func.func @transform_5(%arg0: i32, %arg1: i32, %arg2: i32) -> (i32, i32) {
    %c0_i32 = arith.constant 0 : i32
    %c0_i32_0 = arith.constant 0 : i32
    %c0_i32_1 = arith.constant 0 : i32
    return %c0_i32, %c0_i32_0 : i32, i32
  }
  func.func @transform_6(%arg0: i32, %arg1: i32, %arg2: i32) -> (i32, i32, i32) {
    %c0_i32 = arith.constant 0 : i32
    %c0_i32_0 = arith.constant 0 : i32
    return %arg0, %arg1, %c0_i32 : i32, i32, i32
  }
}

</mosaic_0001>

<bundles_post_ra>
// kernel: tpu_custom_call.1
= control target key start
LH: loop header
LB: loop body
LE: loop exit
PB: predicated region body
PF: predicated region fallthrough
CT: control target
= control target key end

     0   :  { %s2701_s0 = inlined_call_operand.hbm [shape: f32[2,8,32], index: 0, kind: input, shape index: {}]   ;;  %s2702_s1 = inlined_call_operand.hbm [shape: f32[2,8,32], index: 1, kind: input, shape index: {}]   ;;  %s2703_s2 = inlined_call_operand.hbm [shape: f32[32,32], index: 2, kind: input, shape index: {}]   ;;  %s2704_s3 = inlined_call_operand.hbm [shape: f32[32,64], index: 3, kind: input, shape index: {}]   ;;  %s2705_s4 = inlined_call_operand.hbm [shape: f32[32,32], index: 4, kind: input, shape index: {}]   ;;  %s2706_s5 = inlined_call_operand.vmem [shape: f32[1,32], index: 5, kind: input, shape index: {}]   ;;  %s2707_s6 = inlined_call_operand.hbm [shape: f32[2,8,32], index: 6, kind: output, shape index: {}]  }
   0x1   :  { %2714 = sst [smem:[#allocation23_spill]] %s2703_s2 }
   0x2   :  { %2715 = sst [smem:[#allocation24_spill]] %s2704_s3 }
   0x3   :  { %2716 = sst [smem:[#allocation25_spill]] %s2705_s4 }
   0x4   :  { %11 = vsyncpa [#allocation7], 0 }
   0x5   :  { %13 = vsyncpa [#allocation7 + $0x1], 0 }
   0x6   :  { %14 = vsyncpa [#allocation10], 0 }
   0x7   :  { %16 = vsyncpa [#allocation10 + $0x1], 0 }
   0x8   :  { %17 = vsyncpa [#allocation13], 0 }
   0x9   :  { %18 = vsyncpa [#allocation8], 0 }
   0xa   :  { %20 = vsyncpa [#allocation8 + $0x1], 0  ;;  %s2228_s21 = smov 0   ;;  %s2230_s22 = smov 0  }
   0xb   :  { %s2232_s23 = smov 0   ;;  %s2234_s24 = smov 0  }
   0xc   :  { %s2236_s25 = smov 0   ;;  %s2238_s26 = smov 0  }
   0xd LB: > { %2717 = sst [smem:[#allocation21_spill]] %s2148_s21  ;;  %s2259_s27 = sadd.s32 4294967295, %s2168_s26   ;;  %s2168_s26 = sphi %s2238_s26, %s26_s26   ;;  %s2164_s25 = sphi %s2236_s25, %s2745_s25   ;;  %s2160_s24 = sphi %s2234_s24, %s2744_s24   ;;  %s2156_s23 = sphi %s2232_s23, %s2743_s23   ;;  %s2152_s22 = sphi %s2230_s22, %s2742_s22   ;;  %s2148_s21 = sphi %s2228_s21, %s2741_s21  }
   0xe   : > { %s1630_s28 = sadd.s32 4294967294, %s2168_s26   ;;  %p67_p0 = scmp.ne.s32.totalorder %s2152_s22, %s2148_s21 }
   0xf   : > { %p2708_p1 = scmp.eq.s32.totalorder %s2259_s27, 0  ;;  %p211_p3 = scmp.eq.s32.totalorder %s1630_s28, 1 }
  0x10   : > { %p1631_p5 = scmp.ge.s32.totalorder %s2168_s26, 1  ;;  %p218_p7 = scmp.lt.s32.totalorder %s2168_s26, 3 }
  0x11   : > { %p2268_p4 = por %p2708_p1, %p67_p0  ;;  %p2273_p6 = por %p211_p3, %p67_p0 }
  0x12   : > { %p2278_p8 = pnand %p1631_p5, %p218_p7  ;;  %s2170_s8 = smov [#allocation11]  }
  0x13   : > { %s2718_s29 = scalar_select %p2268_p4, 1, 0 }
  0x14   : > { %s2719_s30 = scalar_select %p2273_p6, 1, 0 }
  0x15   : > { %s2721_s7 = scalar_select %p2278_p8, 1, 0 }
  0x16   : > { %2720 = sst [smem:[#allocation22_spill]] %s2719_s30  ;;  %s230_s9 = sshll.u32 %s2170_s8, 4  ;;  %s2282_s9 = int_to_ptr.vmem [resolvable:$true] %s230_s9 }
  0x17   : > { %p1807_p9 = pneg %p2278_p8  ;;  %s2171_s11 = smov [#allocation12]  }
  0x18   : > { %s243_s12 = sshll.u32 %s2171_s11, 4  ;;  %s2172_s13 = smov [#allocation14]   ;;  %s2293_s12 = int_to_ptr.vmem [resolvable:$true] %s243_s12 }
  0x19   : > { %p2289_p11 = pnand %p1807_p9, %p2708_p1  ;;  %s2295_s14 = sshll.u32 %s2172_s13, 4  ;;  %s257_s14 = int_to_ptr.vmem [resolvable:$true] %s2295_s14 }
  0x1a   : > { %s2723_s2 = sld [smem:[#allocation23_spill]] }
  0x1b   : > { %p2305_p13 = pneg %p2289_p11 }
  0x20   : > { %s1930_s17 = scalar_lea.hbm %s2723_s2, 512 }
  0x21   : > { %p1931_p12 = scmp.ne.s32.totalorder %s2723_s2, %s1930_s17  ;;  %p1937_p5 = scmp.lt.u32.totalorder %s1930_s17, %s2723_s2 }
  0x23   : > { %p1933_p0 = pnand %p2305_p13, %p1931_p12 }
  0x25   : > { %p1934_p3 = pneg %p1933_p0 }
  0x27   : > { %p1939_p7 = pnand %p1937_p5, %p1934_p3 }
  0x29   : > { %1942 = shalt.err (!%p1939_p7)
}
  0x2a   : > { %s1943_s11 = scalar_lea.vmem %s2282_s9, 512  ;;  %p1951_p2 = scmp.lt.s32.totalorder %s2282_s9, %s2282_s9 }
  0x2b   : > { %p1944_p9 = scmp.ne.s32.totalorder %s2282_s9, %s1943_s11  ;;  %p1952_p6 = scmp.lt.s32.totalorder %s1943_s11, %s1943_s11 }
  0x2d   : > { %p1946_p10 = pnand %p1944_p9, %p2305_p13  ;;  %p1953_p12 = por %p1952_p6, %p1951_p2 }
  0x2f   : > { %p1947_p1 = pneg %p1946_p10 }
  0x31   : > { %p1954_p0 = pnand %p1953_p12, %p1947_p1 }
  0x33   : > { %1957 = shalt.err (!%p1954_p0)
}
  0x34   : > { %s2173_s13 = smov 128   ;;  %s2174_s15 = smov 8  }
  0x35   : > { %1810 = dma.hbm_to_vmem [thread:$0]  (!%p2289_p11), %s2723_s2, 512, %s2282_s9, [#allocation10], %s2173_s13, %s2173_s13, %s2174_s15  }
  0x36   : > { %s2725_s3 = sld [smem:[#allocation24_spill]] }
  0x3c   : > { %s1958_s28 = scalar_lea.hbm %s2725_s3, 512 }
  0x3d   : > { %p1959_p1 = scmp.ne.s32.totalorder %s2725_s3, %s1958_s28  ;;  %p1965_p10 = scmp.lt.u32.totalorder %s1958_s28, %s2725_s3 }
  0x3f   : > { %p1961_p2 = pnand %p1959_p1, %p2305_p13 }
  0x41   : > { %p1962_p6 = pneg %p1961_p2 }
  0x43   : > { %p1967_p3 = pnand %p1965_p10, %p1962_p6 }
  0x45   : > { %1970 = shalt.err (!%p1967_p3)
}
  0x46   : > { %s1971_s9 = scalar_lea.vmem %s2293_s12, 512  ;;  %p1979_p12 = scmp.lt.s32.totalorder %s2293_s12, %s2293_s12 }
  0x47   : > { %p1972_p5 = scmp.ne.s32.totalorder %s2293_s12, %s1971_s9  ;;  %p1980_p0 = scmp.lt.s32.totalorder %s1971_s9, %s1971_s9 }
  0x49   : > { %p1974_p7 = pnand %p1972_p5, %p2305_p13  ;;  %p1981_p1 = por %p1980_p0, %p1979_p12 }
  0x4b   : > { %p1975_p9 = pneg %p1974_p7 }
  0x4d   : > { %p1982_p2 = pnand %p1981_p1, %p1975_p9 }
  0x4f   : > { %1985 = shalt.err (!%p1982_p2)
}
  0x50   : > { %1813 = dma.hbm_to_vmem [thread:$0]  (!%p2289_p11), %s2725_s3, 512, %s2293_s12, [#allocation13], %s2173_s13, %s2173_s13, %s2174_s15  }
  0x51   : > { %s2726_s4 = sld [smem:[#allocation25_spill]] }
  0x57   : > { %s1986_s18 = scalar_lea.hbm %s2726_s4, 512 }
  0x58   : > { %p1987_p6 = scmp.ne.s32.totalorder %s2726_s4, %s1986_s18  ;;  %p1993_p5 = scmp.lt.u32.totalorder %s1986_s18, %s2726_s4 }
  0x5a   : > { %p1989_p10 = pnand %p1987_p6, %p2305_p13 }
  0x5c   : > { %p1990_p3 = pneg %p1989_p10 }
  0x5e   : > { %p1995_p7 = pnand %p1993_p5, %p1990_p3 }
  0x60   : > { %1998 = shalt.err (!%p1995_p7)
}
  0x61   : > { %s1999_s9 = scalar_lea.vmem %s257_s14, 512  ;;  %p2007_p1 = scmp.lt.s32.totalorder %s257_s14, %s257_s14 }
  0x62   : > { %p2000_p9 = scmp.ne.s32.totalorder %s257_s14, %s1999_s9  ;;  %p2008_p2 = scmp.lt.s32.totalorder %s1999_s9, %s1999_s9 }
  0x64   : > { %p2002_p12 = pnand %p2000_p9, %p2305_p13  ;;  %p2009_p4 = por %p2008_p2, %p2007_p1 }
  0x66   : > { %p2003_p0 = pneg %p2002_p12 }
  0x68   : > { %p2010_p8 = pnand %p2009_p4, %p2003_p0 }
  0x6a   : > { %2013 = shalt.err (!%p2010_p8)
}
  0x6b   : > { %1816 = dma.hbm_to_vmem [thread:$0]  (!%p2289_p11), %s2726_s4, 512, %s257_s14, [#allocation13], %s2173_s13, %s2173_s13, %s2174_s15  }
  0x6c   : > { %s54_s20 = sadd.s32 1, %s2156_s23  ;;  %s45_s10 = sadd.s32 1, %s2164_s25 }
  0x6d   : > { %p61_p4 = scmp.ne.s32.totalorder %s2156_s23, %s2152_s22  ;;  %p47_p8 = scmp.ge.s32.totalorder %s45_s10, 2 }
  0x6e   : > { %p62_p13 = scmp.eq.s32.totalorder %s2168_s26, 0  ;;  %p2727_p6 = scmp.eq.s32.totalorder %s2259_s27, 1 }
  0x6f   : > { %p1831_p3 = scmp.lt.s32.totalorder %s2168_s26, 2  ;;  %s2747_s10 = smov (%p47_p8, %s45_s10), 0 }
  0x70   : > { %p2384_p10 = por %p2727_p6, %p61_p4  ;;  %p63_p5 = por %p62_p13, %p61_p4 }
  0x71   : > { %s273_s16 = sand.u32 1, %s2156_s23   ;;  %s49_s17 = ssub.s32 %s2164_s25, %s2747_s10 }
  0x72   : > { %s2728_s30 = scalar_select %p2384_p10, 1, 0 }
  0x73   : > { %p52_p11 = scmp.eq.s32.totalorder %s49_s17, 0  ;;  %s2394_s14 = sshll.u32 %s273_s16, 3 }
  0x74   : > { %s1637_s13 = sshll.u32 %s2164_s25, 7  ;;  %s277_s8 = scalar_lea.vmem [#allocation6], %s2394_s14 }
  0x75   : > { %s2398_s15 = scalar_select %p52_p11, %s2156_s23, %s54_s20  }
  0x76   : > { %s2403_s28 = scalar_lea.hbm %s2701_s0, %s1637_s13  ;;  %s285_s11 = sshll.u32 %s277_s8, 4  ;;  %s2406_s11 = int_to_ptr.vmem [resolvable:$true] %s285_s11 }
  0x77   : > { %p2410_p7 = pnand %p1831_p3, %p63_p5  ;;  %s2417_s20 = scalar_lea.hbm %s2702_s1, %s1637_s13 }
  0x78   : > { %s292_s17 = sand.u32 1, %s2168_s26   ;;  %s274_s18 = scalar_lea.sflag [#allocation7], %s273_s16 }
  0x79   : > { %s2014_s19 = scalar_lea.hbm %s2403_s28, 128  ;;  %p2016_p12 = pneg %p2410_p7 }
  0x7a   : > { %p2015_p9 = scmp.ne.s32.totalorder %s2403_s28, %s2014_s19  ;;  %s2019_s3 = scalar_lea.hbm %s2701_s0, 256 }
  0x7b   : > { %p2020_p2 = scmp.lt.u32.totalorder %s2403_s28, %s2701_s0  ;;  %p2021_p4 = scmp.lt.u32.totalorder %s2019_s3, %s2014_s19 }
  0x7c   : > { %p2017_p0 = pnand %p2016_p12, %p2015_p9  ;;  %p2023_p13 = scmp.lt.u32.totalorder %s2014_s19, %s2403_s28 }
  0x7d   : > { %p2022_p8 = por %p2021_p4, %p2020_p2 }
  0x7e   : > { %p2018_p1 = pneg %p2017_p0 }
  0x7f   : > { %p2024_p6 = por %p2023_p13, %p2022_p8 }
  0x81   : > { %p2025_p3 = pnand %p2024_p6, %p2018_p1 }
  0x83   : > { %2028 = shalt.err (!%p2025_p3)
}
  0x84   : > { %s2029_s16 = scalar_lea.vmem %s2406_s11, 128  ;;  %s2175_s2 = smov [#allocation6]  }
  0x85   : > { %p2030_p5 = scmp.ne.s32.totalorder %s2406_s11, %s2029_s16  ;;  %s2034_s13 = sshll.u32 %s2175_s2, 4  ;;  %s2035_s13 = int_to_ptr.vmem [resolvable:$false] %s2034_s13 }
  0x86   : > { %s2036_s4 = scalar_lea.vmem %s2035_s13, 256  ;;  %p2037_p0 = scmp.lt.s32.totalorder %s2406_s11, %s2035_s13 }
  0x87   : > { %p2032_p11 = pnand %p2030_p5, %p2016_p12  ;;  %p2038_p2 = scmp.lt.s32.totalorder %s2036_s4, %s2029_s16 }
  0x89   : > { %p2033_p9 = pneg %p2032_p11  ;;  %p2039_p4 = por %p2038_p2, %p2037_p0 }
  0x8b   : > { %p2040_p8 = pnand %p2039_p4, %p2033_p9 }
  0x8d   : > { %2043 = shalt.err (!%p2040_p8)
}
  0x8e   : > { %1820 = dma.hbm_to_vmem [thread:$0]  (!%p2410_p7), %s2403_s28, 128, %s2406_s11, %s274_s18  }
  0x8f   : > { %s296_s3 = scalar_lea.vmem [#allocation9], %s2394_s14  ;;  %s293_s19 = scalar_lea.sflag [#allocation10], %s292_s17 }
  0x90   : > { %s304_s21 = sshll.u32 %s296_s3, 4  ;;  %s2044_s8 = scalar_lea.hbm %s2417_s20, 128  ;;  %s305_s21 = int_to_ptr.vmem [resolvable:$true] %s304_s21 }
  0x91   : > { %p2045_p1 = scmp.ne.s32.totalorder %s2417_s20, %s2044_s8  ;;  %s2049_s2 = scalar_lea.hbm %s2702_s1, 256 }
  0x92   : > { %p2050_p3 = scmp.lt.u32.totalorder %s2417_s20, %s2702_s1  ;;  %p2051_p5 = scmp.lt.u32.totalorder %s2049_s2, %s2044_s8 }
  0x93   : > { %p2047_p13 = pnand %p2045_p1, %p2016_p12  ;;  %p2053_p9 = scmp.lt.u32.totalorder %s2044_s8, %s2417_s20 }
  0x94   : > { %p2052_p11 = por %p2051_p5, %p2050_p3 }
  0x95   : > { %p2048_p6 = pneg %p2047_p13 }
  0x96   : > { %p2054_p0 = por %p2053_p9, %p2052_p11 }
  0x98   : > { %p2055_p2 = pnand %p2054_p0, %p2048_p6 }
  0x9a   : > { %2058 = shalt.err (!%p2055_p2)
}
  0x9b   : > { %s2059_s14 = scalar_lea.vmem %s305_s21, 128  ;;  %s2176_s28 = smov [#allocation9]  }
  0x9c   : > { %p2060_p4 = scmp.ne.s32.totalorder %s305_s21, %s2059_s14  ;;  %s2064_s11 = sshll.u32 %s2176_s28, 4  ;;  %s2065_s11 = int_to_ptr.vmem [resolvable:$false] %s2064_s11 }
  0x9d   : > { %s2066_s17 = scalar_lea.vmem %s2065_s11, 256  ;;  %p2067_p13 = scmp.lt.s32.totalorder %s305_s21, %s2065_s11 }
  0x9e   : > { %p2062_p8 = pnand %p2060_p4, %p2016_p12  ;;  %p2068_p10 = scmp.lt.s32.totalorder %s2066_s17, %s2059_s14 }
  0xa0   : > { %p2063_p1 = pneg %p2062_p8  ;;  %p2069_p3 = por %p2068_p10, %p2067_p13 }
  0xa2   : > { %p2070_p5 = pnand %p2069_p3, %p2063_p1 }
  0xa4   : > { %2073 = shalt.err (!%p2070_p5)
}
  0xa5   : > { %1823 = dma.hbm_to_vmem [thread:$0]  (!%p2410_p7), %s2417_s20, 128, %s305_s21, %s293_s19  }
  0xa6   : > { %p2730_p6 = scmp.ne.s32.totalorder %s2721_s7, 0 }
  0xa7   : > { %s2470_s18 = sand.u32 (!%p2730_p6), 1, %s2152_s22   ;;  %p2731_p10 = scmp.ne.s32.totalorder (!%p2730_p6), %s2718_s29, 0 }
  0xa8   : > { %313 = sbr.rel (%p2730_p6) target bundleno = 1680 (0x690), region = 44  ;;  %s2473_s3 = sshll.u32 (!%p2730_p6), %s2470_s18, 3 }
  0xa9   : > { %s316_s8 = scalar_lea.sflag (!%p2730_p6), [#allocation7], %s2470_s18  ;;  %s319_s12 = scalar_lea.vmem (!%p2730_p6), [#allocation6], %s2473_s3 }
  0xaf   : > { %2127 = dma.done.wait (%p2731_p10), %s316_s8, 128  }
  0xb0   : > { %2129 = vsyncadd (%p2731_p10), %s316_s8, 4294967168  ;;  %s324_s7 = sand.u32 1, %s2259_s27   ;;  %s328_s20 = scalar_lea.vmem [#allocation9], %s2473_s3 }
  0xb1   : > { %s325_s9 = scalar_lea.sflag [#allocation10], %s324_s7 }
  0xb2   : > { %2131 = dma.done.wait (%p2731_p10), %s325_s9, 128  }
  0xb3   : > { %2133 = vsyncadd (%p2731_p10), %s325_s9, 4294967168  ;;  %p2732_p7 = scmp.eq.s32.totalorder %s2259_s27, 0 }
  0xb5   : > { %2135 = dma.done.wait (%p2732_p7), [#allocation10], 512   ;;  %p2733_p12 = pmov %p2732_p7 }
  0xb6   : > { %p2734_p11 = pmov %p2732_p7 }
  0xb7   : > { %2137 = vsyncadd (%p2733_p12), [#allocation10], 4294966784 }
  0xb8   : > { %2139 = dma.done.wait (%p2734_p11), [#allocation13], 1024   ;;  %p2735_p9 = pmov %p2732_p7 }
  0xb9   : > { %v2177_v0 = vmov 0.0|0.0   ;;  %vm2178_vm0 = vmmov 0   ;;  %v2179_v1 = vmov 0.0   ;;  %v381_v2 = vld [vmem:[#allocation11] sm:$0xff]  ;;  %v382_v3 = vld [vmem:[#allocation11 + $0x8] sm:$0xff]  ;;  %v383_v4 = vld [vmem:[#allocation11 + $0x10] sm:$0xff]  ;;  %v560_v28 = vlaneseq }
  0xba   : > { %2141 = vsyncadd (%p2735_p9), [#allocation13], 4294966272  ;;  %1771 = vmatprep.subr.bf16.mxu0 %v2177_v0  ;;  %1777 = vmatprep.subr.bf16.mxu1 %v2177_v0  ;;  %v1772_v5 = vpack.c.bf16 %v382_v3, %v381_v2  ;;  %v384_v6 = vld [vmem:[#allocation11 + $0x18] sm:$0xff]  ;;  %v481_v7 = vld [vmem:[#allocation12] sm:$0xff]  ;;  %vm385_vm1 = vcmask 261120   ;;  %vm470_vm2 = vcmask 64512  }
  0xbb   : > { %1706 = vmatprep.mubr.msk.f32.mxu0 %vm2178_vm0, %v2179_v1  ;;  %1717 = vmatprep.mubr.msk.f32.mxu1 %vm2178_vm0, %v2179_v1  ;;  %v482_v8 = vld [vmem:[#allocation12 + $0x8] sm:$0xff]  ;;  %v483_v10 = vld [vmem:[#allocation12 + $0x10] sm:$0xff]  ;;  %v484_v11 = vld [vmem:[#allocation12 + $0x18] sm:$0xff]  ;;  %v1775_v12 = vpack.c.bf16 %v384_v6, %v383_v4  ;;  %471 = vst.msk [vmem:[#allocation5] sm:$0xff] %vm470_vm2, %v2179_v1  ;;  %s2180_s27 = smov 112   ;;  %s2181_s29 = smov 120  }
  0xbc   : > { %v1778_v9 = vpack.c.bf16 %v482_v8, %v481_v7  ;;  %1773 = vmatpush3.bf16.msra.mxu0 %v1772_v5  ;;  %v1781_v13 = vpack.c.bf16 %v484_v11, %v483_v10  ;;  %v380_v14 = vld [vmem:[%s319_s12] sm:$0xff]  ;;  %v480_v15 = vld [vmem:[%s328_s20] sm:$0xff]  ;;  %472 = vst.msk [vmem:[#allocation5 + $0x8] sm:$0xff] %vm470_vm2, %v2179_v1  ;;  %473 = vst.msk [vmem:[#allocation5 + $0x10] sm:$0xff] %vm470_vm2, %v2179_v1  ;;  %s2182_s21 = smov 104   ;;  %v561_v29 = vshrl.u32 %v560_v28, 7 }
  0xbd   : > { %1774 = vmatprep.subr.bf16.mxu0 %v2177_v0  ;;  %474 = vst.msk [vmem:[#allocation5 + $0x18] sm:$0xff] %vm470_vm2, %v2179_v1  ;;  %v565_v30 = vand.u32 127, %v560_v28  ;;  %vm461_vm3 = vcmask 7168   ;;  %v2183_v31 = vmov -inf   ;;  %v2184_v36 = vmov 0   ;;  %s2185_s19 = smov 96  }
  0xbe   : > { %1779 = vmatpush3.bf16.msra.mxu1 %v1778_v9  ;;  %462 = vst.msk [vmem:[#allocation3] sm:$0xff] %vm461_vm3, %v2183_v31  ;;  %463 = vst.msk [vmem:[#allocation3 + $0x8] sm:$0xff] %vm461_vm3, %v2183_v31  ;;  %1904 = vset.pattern.permute.xlu1 %v2184_v36  ;;  %s2186_s16 = smov 88   ;;  %s2187_s2 = smov 80   ;;  %vm1389_vm5 = vcmask 130048   ;;  %vm1391_vm6 = vcmask 195584  }
  0xbf   : > { %1780 = vmatprep.subr.bf16.mxu1 %v2177_v0  ;;  %vm568_vm4 = vcmp.gt.s32.totalorder %v565_v30, %v561_v29  ;;  %464 = vst.msk [vmem:[#allocation3 + $0x10] sm:$0xff] %vm461_vm3, %v2183_v31  ;;  %465 = vst.msk [vmem:[#allocation3 + $0x18] sm:$0xff] %vm461_vm3, %v2183_v31  ;;  %1905 = vset.pattern.permute.xlu0 %v2184_v36  ;;  %s2188_s13 = smov 72   ;;  %s2189_s4 = smov 8  }
  0xc0   : > { %1776 = vmatpush3.bf16.msra.mxu0 %v1775_v12  ;;  %466 = vst.msk [vmem:[#allocation4] sm:$0xff] %vm461_vm3, %v2179_v1  ;;  %467 = vst.msk [vmem:[#allocation4 + $0x8] sm:$0xff] %vm461_vm3, %v2179_v1  ;;  %s2190_s14 = smov 16   ;;  %s2191_s28 = smov 24  }
  0xc1   : > { %1730 = vmatprep.subr.mxu0 %v2179_v1  ;;  %468 = vst.msk [vmem:[#allocation4 + $0x10] sm:$0xff] %vm461_vm3, %v2179_v1  ;;  %469 = vst.msk [vmem:[#allocation4 + $0x18] sm:$0xff] %vm461_vm3, %v2179_v1  ;;  %s1664_s8 = sshll.u32 %s2160_s24, 7  ;;  %s373_s12 = scalar_lea.vmem [#allocation15], %s2473_s3 }
  0xc2   : > { %1782 = vmatpush3.bf16.msra.mxu1 %v1781_v13  ;;  %s1494_s7 = sshll.u32 %s373_s12, 4  ;;  %p2736_p2 = scmp.ne.s32.totalorder %s2728_s30, 0  ;;  %s2653_s7 = int_to_ptr.vmem [resolvable:$true] %s1494_s7 }
  0xc3   : > { %1720 = vmatprep.subr.mxu1 %v2179_v1  ;;  %1707 = vmatmul.mubr.msk.f32.vlgmr.msra.gmra.mrb[0].mxu0 %vm385_vm1, %v380_v14  ;;  %s2192_s24 = smov [#allocation15]  }
  0xc4   : > { %1732 = vmatprep.mubr.msk.f32.mxu0 %vm2178_vm0, %v2179_v1  ;;  %s2078_s3 = sshll.u32 %s2192_s24, 4  ;;  %s2079_s3 = int_to_ptr.vmem [resolvable:$false] %s2078_s3 }
  0xc5   : > { %1718 = vmatmul.mubr.msk.f32.vlgmr.msra.gmra.mrb[0].mxu1 %vm385_vm1, %v480_v15  ;;  %v2570_v49 = vld [vmem:[#allocation3] sm:$0xff]  ;;  %v2580_v53 = vld [vmem:[#allocation3 + $0x8] sm:$0xff]  ;;  %p2081_p1 = scmp.lt.s32.totalorder %s2653_s7, %s2079_s3 }
  0xc6   : > { %1722 = vmatprep.mubr.msk.f32.mxu1 %vm2178_vm0, %v2179_v1  ;;  %v2585_v56 = vld [vmem:[#allocation3 + $0x10] sm:$0xff]  ;;  %v2595_v60 = vld [vmem:[#allocation3 + $0x18] sm:$0xff] }
  0xc8   : > { %v1045_v36 = vld [vmem:[#allocation4 + $0x10] sm:$0xff] }
 0x196   : > { %v455_v16 = vpop.f32.mrb[0].mxu0 }
 0x197   : > { %v459_v17 = vmul.f32 0.35355338, %v455_v16  ;;  %v1708_v18 = vpop.f32.mrb[1].mxu0 }
 0x198   : > { %v2523_v19 = vpop.f32.mrb[0].mxu1 }
 0x199   : > { %v1719_v20 = vpop.f32.mrb[1].mxu1  ;;  %950 = vrot.lane.b32.xlu1 %v2523_v19, %s2180_s27  ;;  %759 = vrot.lane.b32.xlu0 %v2523_v19, %s2181_s29  ;;  %460 = vst.msk [vmem:[#allocation2] sm:$0xff] %vm385_vm1, %v459_v17 }
 0x19a   : > { %1721 = vmatpush3.xpose.msk.msra.mxu1 %vm470_vm2, %v2523_v19 }
 0x19b   : > { %1725 = vmatprep.subr.mxu1 %v2179_v1 }
 0x1a0   : > { %v559_v21 = vld [vmem:[#allocation2] sm:$0xff] }
 0x1a1   : > { %948 = vrot.lane.b32.xlu1 %v559_v21, %s2180_s27  ;;  %757 = vrot.lane.b32.xlu0 %v559_v21, %s2181_s29  ;;  %s2651_s27 = scalar_lea.hbm %s2707_s6, %s1664_s8  ;;  %s1480_s29 = scalar_lea.sflag [#allocation8], %s2470_s18 }
 0x1a2   : > { %1723 = vmatmul.mubr.msk.f32.vlgmr.msra.gmra.mrb[2].mxu1 %vm470_vm2, %v559_v21 }
 0x1a3   : > { %1727 = vmatprep.mubr.msk.f32.mxu1 %vm2178_vm0, %v2179_v1 }
 0x1a5   : > { %1139 = vrot.lane.b32.xlu1 %v559_v21, %s2182_s21  ;;  %1141 = vrot.lane.b32.xlu0 %v2523_v19, %s2182_s21  ;;  %s2074_s21 = scalar_lea.vmem %s2653_s7, 128 }
 0x1a6   : > { %p2075_p0 = scmp.ne.s32.totalorder %s2653_s7, %s2074_s21 }
 0x1a8   : > { %p2076_p4 = pnand %p2075_p0, %p2736_p2 }
 0x1aa   : > { %p2077_p8 = pneg %p2076_p4 }
 0x20b   : > { %v760_v22 = vpop.permute.xlu0 %759  ;;  %v951_v23 = vpop.permute.xlu1 %950 }
 0x20c   : > { %1731 = vmatpush3.xpose.msk.msra.mxu0 %vm470_vm2, %v760_v22 }
 0x20d   : > { %1740 = vmatprep.subr.mxu0 %v2179_v1 }
 0x213   : > { %v758_v24 = vpop.permute.xlu0 %757  ;;  %v949_v25 = vpop.permute.xlu1 %948 }
 0x214   : > { %1733 = vmatmul.mubr.msk.f32.vlgmr.msra.gmra.mrb[2].mxu0 %vm470_vm2, %v758_v24 }
 0x215   : > { %1741 = vmatpush3.xpose.msk.msra.mxu0 %vm470_vm2, %v951_v23  ;;  %1742 = vmatprep.mubr.msk.f32.mxu0 %vm2178_vm0, %v2179_v1 }
 0x216   : > { %1750 = vmatprep.subr.mxu0 %v2179_v1 }
 0x217   : > { %v1142_v26 = vpop.permute.xlu0 %1141  ;;  %v1140_v27 = vpop.permute.xlu1 %1139 }
 0x218   : > { %1743 = vmatmul.mubr.msk.f32.vlgmr.msra.gmra.mrb[4].mxu0 %vm470_vm2, %v949_v25 }
 0x219   : > { %1751 = vmatpush3.xpose.msk.msra.mxu0 %vm470_vm2, %v1142_v26  ;;  %1752 = vmatprep.mubr.msk.f32.mxu0 %vm2178_vm0, %v2179_v1 }
 0x21a   : > { %1783 = vmatprep.subr.bf16.mxu0 %v2177_v0 }
 0x21c   : > { %1753 = vmatmul.mubr.msk.f32.vlgmr.msra.gmra.mrb[6].mxu0 %vm470_vm2, %v1140_v27 }
 0x21d   : > { %1768 = vmatprep.mubr.msk.f32.mxu0 %vm2178_vm0, %v2179_v1 }
 0x275   : > { %v642_v32 = vpop.f32.mrb[2].mxu1 }
 0x276   : > { %v646_v33 = vsel %vm568_vm4, -inf, %v642_v32  ;;  %v1724_v34 = vpop.f32.mrb[3].mxu1 }
 0x277   : > { %v648_v35 = vsel %vm470_vm2, %v646_v33, -inf }
 0x278   : > { %649 = vmax.xlane.f32.xlu0 %v648_v35 }
 0x2e7   : > { %v831_v37 = vpop.f32.mrb[2].mxu0 }
 0x2e8   : > { %v835_v38 = vsel %vm568_vm4, -inf, %v831_v37  ;;  %v1734_v39 = vpop.f32.mrb[3].mxu0 }
 0x2e9   : > { %v838_v40 = vsel %vm470_vm2, %v835_v38, -inf }
 0x2ea   : > { %839 = vmax.xlane.f32.xlu1 %v838_v40 }
 0x2eb   : > { %v1022_v41 = vpop.f32.mrb[4].mxu0 }
 0x2ec   : > { %v1026_v42 = vsel %vm568_vm4, -inf, %v1022_v41  ;;  %v1744_v43 = vpop.f32.mrb[5].mxu0  ;;  %v663_v41 = vld [vmem:[#allocation4] sm:$0xff] }
 0x2ed   : > { %v1029_v44 = vsel %vm470_vm2, %v1026_v42, -inf  ;;  %v1236_v43 = vld [vmem:[#allocation4 + $0x18] sm:$0xff] }
 0x2ee   : > { %1030 = vmax.xlane.f32.xlu0 %v1029_v44 }
 0x2ef   : > { %v1213_v45 = vpop.f32.mrb[6].mxu0 }
 0x2f0   : > { %v1217_v46 = vsel %vm568_vm4, -inf, %v1213_v45  ;;  %v1754_v47 = vpop.f32.mrb[7].mxu0 }
 0x2f1   : > { %v1220_v48 = vsel %vm470_vm2, %v1217_v46, -inf }
 0x2f2   : > { %1221 = vmax.xlane.f32.xlu0 %v1220_v48 }
 0x305   : > { %v650_v50 = vpop.xlane.xlu0 %649 }
 0x306   : > { %v2573_v51 = vmax.f32 %v2570_v49, %v650_v50 }
 0x308   : > { %v652_v52 = vsub.f32 %v2570_v49, %v2573_v51  ;;  %671 = vst.msk [vmem:[#allocation3] sm:$0xff] %vm461_vm3, %v2573_v51  ;;  %657 = vperm.xlu1 %1904, %v2573_v51  }
 0x30a   : > { %v653_v32 = vmul.f32 1.442695, %v652_v52 }
 0x377   : > { %v840_v54 = vpop.xlane.xlu1 %839 }
 0x378   : > { %v2583_v55 = vmax.f32 %v2580_v53, %v840_v54 }
 0x37a   : > { %v842_v57 = vsub.f32 %v2580_v53, %v2583_v55  ;;  %861 = vst.msk [vmem:[#allocation3 + $0x8] sm:$0xff] %vm461_vm3, %v2583_v55  ;;  %847 = vperm.xlu0 %1905, %v2583_v55  }
 0x37b   : > { %v1031_v58 = vpop.xlane.xlu0 %1030 }
 0x37c   : > { %v2593_v59 = vmax.f32 %v2585_v56, %v1031_v58  ;;  %v843_v27 = vmul.f32 1.442695, %v842_v57  ;;  %v863_v58 = vld [vmem:[#allocation5 + $0x8] sm:$0xff] }
 0x37e   : > { %v1033_v61 = vsub.f32 %v2585_v56, %v2593_v59  ;;  %1052 = vst.msk [vmem:[#allocation3 + $0x10] sm:$0xff] %vm461_vm3, %v2593_v59  ;;  %1038 = vperm.xlu1 %1904, %v2593_v59  }
 0x37f   : > { %v1222_v62 = vpop.xlane.xlu0 %1221 }
 0x380   : > { %v1223_v63 = vmax.f32 %v2595_v60, %v1222_v62  ;;  %v1034_v28 = vmul.f32 1.442695, %v1033_v61 }
 0x382   : > { %v1224_v2 = vsub.f32 %v2595_v60, %v1223_v63  ;;  %1243 = vst.msk [vmem:[#allocation3 + $0x18] sm:$0xff] %vm461_vm3, %v1223_v63  ;;  %1229 = vperm.xlu1 %1904, %v1223_v63   ;;  %v1054_v63 = vld [vmem:[#allocation5 + $0x10] sm:$0xff] }
 0x384   : > { %v1225_v29 = vmul.f32 1.442695, %v1224_v2 }
 0x386   : > { %679 = vrot.lane.b32.xlu1 %v2523_v19, %s2185_s19  ;;  %s2080_s19 = scalar_lea.vmem %s2079_s3, 256 }
 0x387   : > { %v658_v3 = vpop.permute.xlu1 %657  ;;  %p2082_p13 = scmp.lt.s32.totalorder %s2080_s19, %s2074_s21 }
 0x388   : > { %v660_v4 = vsub.f32 %v646_v33, %v658_v3  ;;  %v854_v33 = vld [vmem:[#allocation4 + $0x8] sm:$0xff] }
 0x389   : > { %p2083_p3 = por %p2082_p13, %p2081_p1 }
 0x38a   : > { %870 = vrot.lane.b32.xlu1 %v2523_v19, %s2186_s16  ;;  %v661_v5 = vmul.f32 1.442695, %v660_v4 }
 0x38b   : > { %p2084_p5 = pnand %p2083_p3, %p2077_p8 }
 0x38c   : > { %1906 = vpow2.f32 %v661_v5 }
 0x38e   : > { %1061 = vrot.lane.b32.xlu1 %v2523_v19, %s2187_s2 }
 0x392   : > { %1252 = vrot.lane.b32.xlu1 %v2523_v19, %s2188_s13 }
 0x396   : > { %v1907_v16 = vpop.eup %1906 }
 0x397   : > { %v665_v25 = vsel %vm470_vm2, %v1907_v16, 0.0 }
 0x3f9   : > { %v848_v6 = vpop.permute.xlu0 %847 }
 0x3fa   : > { %v850_v7 = vsub.f32 %v835_v38, %v848_v6 }
 0x3fc   : > { %v851_v8 = vmul.f32 1.442695, %v850_v7  ;;  %v1245_v7 = vld [vmem:[#allocation5 + $0x18] sm:$0xff] }
 0x3fd   : > { %v1039_v9 = vpop.permute.xlu1 %1038 }
 0x3fe   : > { %1908 = vpow2.f32 %v851_v8  ;;  %v1041_v10 = vsub.f32 %v1026_v42, %v1039_v9 }
 0x400   : > { %v1042_v11 = vmul.f32 1.442695, %v1041_v10 }
 0x401   : > { %v1230_v12 = vpop.permute.xlu1 %1229 }
 0x402   : > { %1910 = vpow2.f32 %v1042_v11  ;;  %v1232_v13 = vsub.f32 %v1217_v46, %v1230_v12 }
 0x404   : > { %v1233_v14 = vmul.f32 1.442695, %v1232_v13 }
 0x405   : > { %v680_v15 = vpop.permute.xlu1 %679 }
 0x406   : > { %1912 = vpow2.f32 %v1233_v14  ;;  %1726 = vmatpush3.msra.mxu1 %v680_v15 }
 0x407   : > { %1728 = vmatmul.mubr.msk.f32.vlgmr.msra.gmra.mrb[4].mxu1 %vm470_vm2, %v1907_v16  ;;  %1735 = vmatprep.subr.mxu1 %v2179_v1  ;;  %1914 = vpow2.f32 %v843_v27  ;;  %v1393_v16 = vld [vmem:[#allocation14] sm:$0xff] }
 0x408   : > { %v1909_v17 = vpop.eup %1908  ;;  %1737 = vmatprep.mubr.msk.f32.mxu1 %vm2178_vm0, %v2179_v1  ;;  %1916 = vpow2.f32 %v1034_v28  ;;  %v672_v28 = vld [vmem:[#allocation5] sm:$0xff] }
 0x409   : > { %v871_v18 = vpop.permute.xlu1 %870  ;;  %v856_v19 = vsel %vm470_vm2, %v1909_v17, 0.0  ;;  %1918 = vpow2.f32 %v1225_v29 }
 0x40a   : > { %1736 = vmatpush3.msra.mxu1 %v871_v18  ;;  %857 = vadd.xlane.f32.xlu1 %v856_v19  ;;  %1920 = vpow2.f32 %v653_v32  ;;  %v1395_v19 = vld [vmem:[#allocation14 + $0x10] sm:$0xff] }
 0x40b   : > { %1738 = vmatmul.mubr.msk.f32.vlgmr.msra.gmra.mrb[6].mxu1 %vm470_vm2, %v1909_v17  ;;  %1745 = vmatprep.subr.mxu1 %v2179_v1  ;;  %v1394_v17 = vld [vmem:[#allocation14 + $0x8] sm:$0xff] }
 0x40c   : > { %v1911_v20 = vpop.eup %1910  ;;  %1747 = vmatprep.mubr.msk.f32.mxu1 %vm2178_vm0, %v2179_v1  ;;  %v1784_v18 = vpack.c.bf16 %v1394_v17, %v1393_v16 }
 0x40d   : > { %v1062_v21 = vpop.permute.xlu1 %1061  ;;  %v1047_v22 = vsel %vm470_vm2, %v1911_v20, 0.0 }
 0x40e   : > { %1048 = vadd.xlane.f32.xlu0 %v1047_v22  ;;  %1746 = vmatpush3.msra.mxu1 %v1062_v21 }
 0x40f   : > { %1748 = vmatmul.mubr.msk.f32.vlgmr.msra.gmra.mrb[8].mxu1 %vm470_vm2, %v1911_v20  ;;  %1755 = vmatprep.subr.mxu1 %v2179_v1  ;;  %v1396_v20 = vld [vmem:[#allocation14 + $0x18] sm:$0xff] }
 0x410   : > { %v1913_v23 = vpop.eup %1912  ;;  %1757 = vmatprep.mubr.msk.f32.mxu1 %vm2178_vm0, %v2179_v1  ;;  %1785 = vmatpush3.bf16.msra.mxu0 %v1784_v18  ;;  %v1787_v21 = vpack.c.bf16 %v1396_v20, %v1395_v19 }
 0x411   : > { %v1253_v24 = vpop.permute.xlu1 %1252  ;;  %v1238_v26 = vsel %vm470_vm2, %v1913_v23, 0.0  ;;  %v1915_v1 = vpop.eup %1914  ;;  %1786 = vmatprep.subr.bf16.mxu0 %v2177_v0 }
 0x412   : > { %666 = vadd.xlane.f32.xlu0 %v665_v25  ;;  %1756 = vmatpush3.msra.mxu1 %v1253_v24  ;;  %v1917_v30 = vpop.eup %1916  ;;  %v855_v34 = vmul.f32 %v1915_v1, %v854_v33 }
 0x413   : > { %1239 = vadd.xlane.f32.xlu1 %v1238_v26  ;;  %1758 = vmatmul.mubr.msk.f32.vlgmr.msra.gmra.mrb[10].mxu1 %vm470_vm2, %v1913_v23  ;;  %v1919_v31 = vpop.eup %1918  ;;  %v1046_v38 = vmul.f32 %v1917_v30, %v1045_v36 }
 0x414   : > { %v1921_v39 = vpop.eup %1920  ;;  %v1237_v45 = vmul.f32 %v1919_v31, %v1236_v43  ;;  %1788 = vmatpush3.bf16.msra.mxu0 %v1787_v21 }
 0x415   : > { %v664_v44 = vmul.f32 %v1921_v39, %v663_v41 }
 0x424   : > { %866 = vperm.xlu1 %1904, %v1915_v1  }
 0x428   : > { %1248 = vperm.xlu1 %1904, %v1919_v31   ;;  %1057 = vperm.xlu0 %1905, %v1917_v30  }
 0x497   : > { %v858_v35 = vpop.xlane.xlu1 %857 }
 0x498   : > { %v859_v37 = vadd.f32 %v858_v35, %v855_v34 }
 0x49a   : > { %860 = vst.msk [vmem:[#allocation4 + $0x8] sm:$0xff] %vm461_vm3, %v859_v37 }
 0x49b   : > { %v1049_v40 = vpop.xlane.xlu0 %1048 }
 0x49c   : > { %v1050_v42 = vadd.f32 %v1049_v40, %v1046_v38 }
 0x49e   : > { %1051 = vst.msk [vmem:[#allocation4 + $0x10] sm:$0xff] %vm461_vm3, %v1050_v42  ;;  %v1661_v42 = vld [vmem:[%s2706_s5] ss:$0 sm:$0xff] }
 0x49f   : > { %v667_v46 = vpop.xlane.xlu0 %666 }
 0x4a0   : > { %v1240_v47 = vpop.xlane.xlu1 %1239  ;;  %v668_v48 = vadd.f32 %v667_v46, %v664_v44 }
 0x4a1   : > { %v1241_v49 = vadd.f32 %v1240_v47, %v1237_v45  ;;  %v1343_v50 = vld [vmem:[#allocation4 + $0x8] sm:$0xff] }
 0x4a2   : > { %670 = vst.msk [vmem:[#allocation4] sm:$0xff] %vm461_vm3, %v668_v48  ;;  %1922 = vrcp.f32 %v1343_v50 }
 0x4a3   : > { %1242 = vst.msk [vmem:[#allocation4 + $0x18] sm:$0xff] %vm461_vm3, %v1241_v49 }
 0x4a4   : > { %v867_v59 = vpop.permute.xlu1 %866 }
 0x4a5   : > { %v1354_v51 = vld [vmem:[#allocation4 + $0x10] sm:$0xff]  ;;  %v869_v62 = vmul.f32 %v867_v59, %v863_v58 }
 0x4a6   : > { %1924 = vrcp.f32 %v1354_v51 }
 0x4a7   : > { %v1058_v2 = vpop.permute.xlu0 %1057 }
 0x4a8   : > { %v1060_v6 = vmul.f32 %v1058_v2, %v1054_v63  ;;  %v1249_v8 = vpop.permute.xlu1 %1248 }
 0x4a9   : > { %v1333_v54 = vld [vmem:[#allocation4] sm:$0xff]  ;;  %v1251_v12 = vmul.f32 %v1249_v8, %v1245_v7 }
 0x4aa   : > { %v1365_v52 = vld [vmem:[#allocation4 + $0x18] sm:$0xff] }
 0x4ab   : > { %1926 = vrcp.f32 %v1365_v52 }
 0x4ac   : > { %v1923_v53 = vpop.eup %1922  ;;  %1928 = vrcp.f32 %v1333_v54 }
 0x4ad   : > { %1349 = vperm.xlu1 %1904, %v1923_v53  }
 0x4b0   : > { %v1925_v55 = vpop.eup %1924 }
 0x4b1   : > { %1360 = vperm.xlu0 %1905, %v1925_v55  }
 0x4b5   : > { %v1927_v56 = vpop.eup %1926  ;;  %675 = vperm.xlu0 %1905, %v1921_v39  }
 0x4b6   : > { %1371 = vperm.xlu1 %1904, %v1927_v56   ;;  %v1929_v57 = vpop.eup %1928 }
 0x4ba   : > { %1338 = vperm.xlu1 %1904, %v1929_v57  }
 0x4da   : > { %v751_v60 = vpop.f32.mrb[4].mxu1 }
 0x4db   : > { %v1729_v61 = vpop.f32.mrb[5].mxu1 }
 0x4de   : > { %v942_v3 = vpop.f32.mrb[6].mxu1 }
 0x4df   : > { %v946_v4 = vadd.f32 %v942_v3, %v869_v62  ;;  %v1739_v5 = vpop.f32.mrb[7].mxu1 }
 0x4e1   : > { %947 = vst.msk [vmem:[#allocation5 + $0x8] sm:$0xff] %vm470_vm2, %v946_v4 }
 0x4e2   : > { %v1133_v9 = vpop.f32.mrb[8].mxu1 }
 0x4e3   : > { %v1137_v10 = vadd.f32 %v1133_v9, %v1060_v6  ;;  %v1749_v11 = vpop.f32.mrb[9].mxu1 }
 0x4e5   : > { %1138 = vst.msk [vmem:[#allocation5 + $0x10] sm:$0xff] %vm470_vm2, %v1137_v10 }
 0x4e6   : > { %v1324_v13 = vpop.f32.mrb[10].mxu1 }
 0x4e7   : > { %v1328_v14 = vadd.f32 %v1324_v13, %v1251_v12  ;;  %v1759_v15 = vpop.f32.mrb[11].mxu1 }
 0x4e8   : > { %v1346_v22 = vld [vmem:[#allocation5 + $0x8] sm:$0xff] }
 0x4e9   : > { %1329 = vst.msk [vmem:[#allocation5 + $0x18] sm:$0xff] %vm470_vm2, %v1328_v14 }
 0x4ec   : > { %v1357_v25 = vld [vmem:[#allocation5 + $0x10] sm:$0xff] }
 0x4f0   : > { %v1368_v1 = vld [vmem:[#allocation5 + $0x18] sm:$0xff] }
 0x52c   : > { %v1350_v23 = vpop.permute.xlu1 %1349 }
 0x52d   : > { %v1352_v24 = vmul.f32 %v1350_v23, %v1346_v22 }
 0x52f   : > { %1376 = vrot.lane.b32.xlu0 %v1352_v24, %s2189_s4 }
 0x530   : > { %v1361_v26 = vpop.permute.xlu0 %1360 }
 0x531   : > { %v1363_v27 = vmul.f32 %v1361_v26, %v1357_v25 }
 0x533   : > { %1380 = vrot.lane.b32.xlu1 %v1363_v27, %s2190_s14 }
 0x534   : > { %v676_v29 = vpop.permute.xlu0 %675 }
 0x535   : > { %v1372_v30 = vpop.permute.xlu1 %1371  ;;  %v678_v31 = vmul.f32 %v676_v29, %v672_v28 }
 0x536   : > { %v1374_v0 = vmul.f32 %v1372_v30, %v1368_v1 }
 0x537   : > { %v755_v32 = vadd.f32 %v751_v60, %v678_v31 }
 0x538   : > { %1384 = vrot.lane.b32.xlu0 %v1374_v0, %s2191_s28 }
 0x539   : > { %756 = vst.msk [vmem:[#allocation5] sm:$0xff] %vm470_vm2, %v755_v32  ;;  %v1339_v33 = vpop.permute.xlu1 %1338 }
 0x540   : > { %v1335_v34 = vld [vmem:[#allocation5] sm:$0xff] }
 0x541   : > { %v1341_v36 = vmul.f32 %v1339_v33, %v1335_v34 }
 0x5a1   : > { %v1377_v35 = vpop.permute.xlu0 %1376 }
 0x5a2   : > { %v1388_v38 = vsel %vm470_vm2, %v1341_v36, %v1377_v35 }
 0x5a5   : > { %v1381_v37 = vpop.permute.xlu1 %1380 }
 0x5a6   : > { %v1390_v39 = vsel %vm1389_vm5, %v1388_v38, %v1381_v37 }
 0x5aa   : > { %v1385_v40 = vpop.permute.xlu0 %1384 }
 0x5ab   : > { %v1392_v41 = vsel %vm1391_vm6, %v1390_v39, %v1385_v40 }
 0x5ac   : > { %1769 = vmatmul.mubr.msk.f32.vlgmr.msra.gmra.mrb[8].mxu0 %vm385_vm1, %v1392_v41 }
 0x67f   : > { %v1474_v43 = vpop.f32.mrb[8].mxu0 }
 0x680   : > { %v1475_v44 = vadd.f32 %v1661_v42, %v1474_v43  ;;  %v1770_v45 = vpop.f32.mrb[9].mxu0 }
 0x682   : > { %1478 = vst.msk [vmem:[%s373_s12] sm:$0xff] %vm385_vm1, %v1475_v44 }
 0x683   : > { %2087 = shalt.err (!%p2084_p5)
}
 0x684   : > { %s2088_s18 = scalar_lea.hbm %s2651_s27, 128  ;;  %s2092_s13 = scalar_lea.hbm %s2707_s6, 256 }
 0x685   : > { %p2089_p6 = scmp.ne.s32.totalorder %s2651_s27, %s2088_s18  ;;  %p2093_p12 = scmp.lt.u32.totalorder %s2651_s27, %s2707_s6 }
 0x686   : > { %p2094_p11 = scmp.lt.u32.totalorder %s2092_s13, %s2088_s18  ;;  %p2096_p0 = scmp.lt.u32.totalorder %s2088_s18, %s2651_s27 }
 0x687   : > { %p2090_p10 = pnand %p2089_p6, %p2736_p2 }
 0x688   : > { %p2095_p9 = por %p2094_p11, %p2093_p12 }
 0x689   : > { %p2091_p7 = pneg %p2090_p10 }
 0x68a   : > { %p2097_p4 = por %p2096_p0, %p2095_p9 }
 0x68c   : > { %p2098_p8 = pnand %p2097_p4, %p2091_p7 }
 0x68e   : > { %2101 = shalt.err (!%p2098_p8)
}
 0x68f   : > { %1805 = dma.vmem_to_hbm [thread:$0]  (%p2736_p2), %s2653_s7, 128, %s2651_s27, %s1480_s29  }
 0x690 PF: > { %s2737_s28 = sld [smem:[#allocation21_spill]]  ;;  %s2738_s11 = sld [smem:[#allocation22_spill]] }
 0x691   : > { %p2740_p13 = scmp.ge.s32.totalorder %s2168_s26, 2 }
 0x696   : > { %s1506_s17 = sand.u32 1, %s2737_s28   ;;  %p2739_p1 = scmp.ne.s32.totalorder %s2738_s11, 0 }
 0x697   : > { %s1507_s8 = scalar_lea.sflag [#allocation8], %s1506_s17 }
 0x698   : > { %p1825_p3 = pnand %p2740_p13, %p2739_p1 }
 0x69a   : > { %2143 = dma.done.wait (!%p1825_p3), %s1507_s8, 128  }
 0x69b   : > { %2145 = vsyncadd (!%p1825_p3), %s1507_s8, 4294967168  ;;  %s26_s26 = sadd.s32 1, %s2168_s26   ;;  %s2741_s21 = smov %s2152_s22 }
 0x69c   : > { %p23_p5 = scmp.ge.s32.totalorder %s26_s26, 4   ;;  %s2742_s22 = smov %s2156_s23 }
 0x69d   : > { %s2743_s23 = smov %s2398_s15  ;;  %s2744_s24 = smov %s2164_s25 }
 0x69e   : > { %s2745_s25 = smov %s2747_s10  ;;  %25 = sbr.rel (!%p23_p5) target bundleno = 13 (0xd), region = 141 }
 0x6a5   :  { %1512 = vsyncpa [#allocation7], 1 }
 0x6a6   :  { %1514 = vsyncpa [#allocation7 + $0x1], 1 }
 0x6a7   :  { %1515 = vsyncpa [#allocation10], 1 }
 0x6a8   :  { %1517 = vsyncpa [#allocation10 + $0x1], 1 }
 0x6a9   :  { %1518 = vsyncpa [#allocation13], 1 }
 0x6aa   :  { %1519 = vsyncpa [#allocation8], 1 }
 0x6ab   :  { %1521 = vsyncpa [#allocation8 + $0x1], 1 }

</bundles_post_ra>
